<compile_context>
chip_gen: v5e
topology: v5e:2x2
jax: 0.10.0
libtpu: 0.0.40
codegen_flags: <defaults>
</compile_context>

<pallas_src>
import jax
import jax.numpy as jnp
from jax.experimental import pallas as pl
from jax.experimental.pallas import tpu as pltpu


# ----------------------------------------------------------------------------
# Kernel A: down-sample conv (matmul over im2col patches) + InstanceNorm+ReLU
#           + fused f/h 1x1 projections.          grid=(B,), "parallel"
# ----------------------------------------------------------------------------
def _down_proj_kernel(p_ref, wds_ref, bds_ref, g1_ref, b1_ref,
                      wfh_ref, bfh_ref, xd_ref, fh_ref):
    z = jnp.dot(p_ref[0], wds_ref[...], preferred_element_type=jnp.float32)
    z = z + bds_ref[...]                                      # (Npos, C_OUT)
    mean = jnp.mean(z, axis=0, keepdims=True)                 # InstanceNorm2d:
    var = jnp.mean(jnp.square(z - mean), axis=0, keepdims=True)  # biased var
    xd = (z - mean) * jax.lax.rsqrt(var + 1e-5)
    xd = jnp.maximum(xd * g1_ref[...] + b1_ref[...], 0.0)     # affine + ReLU
    xd_ref[0] = xd
    fh_ref[0] = (jnp.dot(xd, wfh_ref[...], preferred_element_type=jnp.float32)
                 + bfh_ref[...])                              # fused f|h proj


# ----------------------------------------------------------------------------
# Kernel B: attention core with the g-projection folded into the score matmul.
#           grid=(B,), "parallel"
# ----------------------------------------------------------------------------
def _attn_kernel(xd_ref, fpt_ref, hp_ref, wg_ref, bg_ref, o_ref):
    fpt = fpt_ref[0]                                                     # (cq, Nf)
    m = jnp.dot(wg_ref[...], fpt, preferred_element_type=jnp.float32)    # (C_OUT, Nf)
    sb = jnp.dot(bg_ref[...], fpt, preferred_element_type=jnp.float32)   # (1, Nf)
    s = jnp.dot(xd_ref[0], m, preferred_element_type=jnp.float32) + sb   # (Ng, Nf)
    s = s - jnp.max(s, axis=-1, keepdims=True)                           # stable
    p = jnp.exp(s)
    l = jnp.sum(p, axis=-1, keepdims=True)
    pv = jnp.dot(p, hp_ref[0], preferred_element_type=jnp.float32)       # (Ng, cq)
    o_ref[0] = pv * pl.reciprocal(l, approx=True)


# ----------------------------------------------------------------------------
# Kernel C: phase-decomposed ConvTranspose2d (4 phases x 2x2 taps) +
#           InstanceNorm + ReLU + gamma-gated residual.   grid=(B,), "parallel"
# ----------------------------------------------------------------------------
def _upsample_kernel(pat_ref, wph_ref, bup_ref, g2_ref, b2_ref,
                     gam_ref, xres_ref, out_ref):
    nph = pat_ref.shape[1]
    npos = pat_ref.shape[3]
    inv_n = 1.0 / float(nph * npos)

    ys = []
    for ph in range(nph):                                     # static unroll (4)
        y = (jnp.dot(wph_ref[ph], pat_ref[0, ph],
                     preferred_element_type=jnp.float32) + bup_ref[...])
        ys.append(y)                                          # (C_IN, npos)

    # InstanceNorm statistics over ALL output positions (all phases together)
    mean = sum(jnp.sum(y, axis=1, keepdims=True) for y in ys) * inv_n
    var = sum(jnp.sum(jnp.square(y - mean), axis=1, keepdims=True)
              for y in ys) * inv_n
    inv_std = jax.lax.rsqrt(var + 1e-5)

    gam = gam_ref[...]                                        # (1,1) broadcast
    for ph in range(nph):
        yn = (ys[ph] - mean) * inv_std * g2_ref[...] + b2_ref[...]
        yn = jnp.maximum(yn, 0.0)
        out_ref[0, ph] = gam * yn + xres_ref[0, ph]           # fused residual


# ----------------------------------------------------------------------------
# JAX glue: padding / im2col / pooling / phase bookkeeping (data movement only)
# ----------------------------------------------------------------------------

# For stride-2, k=4, pad=1 transpose conv: output parity -> ((offset, k_idx),..)
_TAPS = (((-1, 3), (0, 1)), ((0, 2), (1, 0)))


def _im2col_downsample(x_nhwc, kh, kw, stride, pad):
    xp = jnp.pad(x_nhwc, ((0, 0), (pad, pad), (pad, pad), (0, 0)), mode="reflect")
    b, h, w, c = xp.shape
    ho = (h - kh) // stride + 1
    wo = (w - kw) // stride + 1
    cols = []
    for ki in range(kh):
        for kj in range(kw):
            cols.append(xp[:, ki:ki + stride * ho:stride,
                           kj:kj + stride * wo:stride, :])
    patches = jnp.concatenate(cols, axis=-1)                  # (B, ho, wo, kh*kw*c)
    return patches.reshape(b, ho * wo, kh * kw * c), ho, wo


def _tconv_phase_patches(o_sp):
    """o_sp: (B, Hs, Ws, cq) -> (B, 4, 4*cq, Hs*Ws) per-phase 2x2-tap patches."""
    b, hs, ws, cq = o_sp.shape
    oz = jnp.pad(o_sp, ((0, 0), (1, 1), (1, 1), (0, 0)))
    phases = []
    for py in range(2):
        for px in range(2):
            taps = []
            for (di, _ky) in _TAPS[py]:
                for (dj, _kx) in _TAPS[px]:
                    taps.append(oz[:, 1 + di:1 + di + hs, 1 + dj:1 + dj + ws, :])
            pat = jnp.concatenate(taps, axis=-1)              # (B, hs, ws, 4cq)
            pat = pat.reshape(b, hs * ws, 4 * cq).transpose(0, 2, 1)
            phases.append(pat)                                # (B, 4cq, hs*ws)
    return jnp.stack(phases, axis=1)                          # (B, 4, 4cq, hs*ws)


def _tconv_phase_weights(w_up):
    """w_up: torch ConvTranspose2d weight (cq, C_dst, 4, 4) -> (4, C_dst, 4*cq)."""
    phases = []
    for py in range(2):
        for px in range(2):
            taps = []
            for (_di, ky) in _TAPS[py]:
                for (_dj, kx) in _TAPS[px]:
                    taps.append(w_up[:, :, ky, kx].T)         # (C_dst, cq)
            phases.append(jnp.concatenate(taps, axis=-1))     # (C_dst, 4cq)
    return jnp.stack(phases, axis=0)                          # (4, C_dst, 4cq)


# ----------------------------------------------------------------------------
# attention.forward  (neighbors=1, down_scale=2, pool_scale=2, sn=False)
# ----------------------------------------------------------------------------
@jax.jit
def attention_forward(x_nchw, params):
    b, c_in, _, _ = x_nchw.shape
    c_out = params["ds_w"].shape[0]
    cq = params["f_w"].shape[0]

    x_nhwc = jnp.transpose(x_nchw, (0, 2, 3, 1))

    # ---- glue: im2col for reflect-pad 4x4 stride-2 down-sample conv ----
    patches, hs, ws = _im2col_downsample(x_nhwc, 4, 4, 2, 1)  # (B, 64, 64)
    n_pos = hs * ws
    k_ds = patches.shape[-1]

    w_ds = jnp.transpose(params["ds_w"], (2, 3, 1, 0)).reshape(k_ds, c_out)
    b_ds = params["ds_b"].reshape(1, c_out)
    g1 = params["ds_in_g"].reshape(1, c_out)
    b1 = params["ds_in_b"].reshape(1, c_out)

    # fused f/h 1x1 projection weights (g is folded into the score matmul)
    w_fh = jnp.concatenate([params["f_w"][:, :, 0, 0].T,
                            params["h_w"][:, :, 0, 0].T], axis=1)   # (c_out, 2cq)
    b_fh = jnp.concatenate([params["f_b"], params["h_b"]]).reshape(1, 2 * cq)

    par = pltpu.CompilerParams(dimension_semantics=("parallel",))

    # ---- kernel A: down-sample conv + InstanceNorm + ReLU + f/h projection ----
    xd, fh = pl.pallas_call(
        _down_proj_kernel,
        grid=(b,),
        in_specs=[
            pl.BlockSpec((1, n_pos, k_ds), lambda i: (i, 0, 0)),
            pl.BlockSpec((k_ds, c_out), lambda i: (0, 0)),
            pl.BlockSpec((1, c_out), lambda i: (0, 0)),
            pl.BlockSpec((1, c_out), lambda i: (0, 0)),
            pl.BlockSpec((1, c_out), lambda i: (0, 0)),
            pl.BlockSpec((c_out, 2 * cq), lambda i: (0, 0)),
            pl.BlockSpec((1, 2 * cq), lambda i: (0, 0)),
        ],
        out_specs=(
            pl.BlockSpec((1, n_pos, c_out), lambda i: (i, 0, 0)),
            pl.BlockSpec((1, n_pos, 2 * cq), lambda i: (i, 0, 0)),
        ),
        out_shape=(
            jax.ShapeDtypeStruct((b, n_pos, c_out), jnp.float32),
            jax.ShapeDtypeStruct((b, n_pos, 2 * cq), jnp.float32),
        ),
        compiler_params=par,
    )(patches, w_ds, b_ds, g1, b1, w_fh, b_fh)

    # ---- glue: 2x2 max pooling of the f / h maps ----
    nf = (hs // 2) * (ws // 2)
    fh_p = fh.reshape(b, hs // 2, 2, ws // 2, 2, 2 * cq).max(axis=(2, 4))
    fh_p = fh_p.reshape(b, nf, 2 * cq)
    f_pt = jnp.transpose(fh_p[..., :cq], (0, 2, 1))           # (B, cq, Nf)
    h_p = fh_p[..., cq:]                                      # (B, Nf, cq)

    w_g = params["g_w"][:, :, 0, 0].T                         # (c_out, cq)
    b_g = params["g_b"].reshape(1, cq)

    # ---- kernel B: scores (K = c_out) + softmax + PV matmul ----
    o = pl.pallas_call(
        _attn_kernel,
        grid=(b,),
        in_specs=[
            pl.BlockSpec((1, n_pos, c_out), lambda i: (i, 0, 0)),
            pl.BlockSpec((1, cq, nf), lambda i: (i, 0, 0)),
            pl.BlockSpec((1, nf, cq), lambda i: (i, 0, 0)),
            pl.BlockSpec((c_out, cq), lambda i: (0, 0)),
            pl.BlockSpec((1, cq), lambda i: (0, 0)),
        ],
        out_specs=pl.BlockSpec((1, n_pos, cq), lambda i: (i, 0, 0)),
        out_shape=jax.ShapeDtypeStruct((b, n_pos, cq), jnp.float32),
        compiler_params=par,
    )(xd, f_pt, h_p, w_g, b_g)

    # ---- glue: phase-decomposed ConvTranspose2d patches / weights ----
    pat = _tconv_phase_patches(o.reshape(b, hs, ws, cq))      # (B, 4, 4cq, n_pos)
    w_ph = _tconv_phase_weights(params["us_w"])               # (4, c_in, 4cq)
    b_up = params["us_b"].reshape(c_in, 1)
    g2 = params["us_in_g"].reshape(c_in, 1)
    b2 = params["us_in_b"].reshape(c_in, 1)
    gam = params["gamma"].reshape(1, 1)

    # residual input in the kernel's phase-major / channel-major layout:
    #   x_res[b, 2*py+px, c, iy*ws+jx] = x[b, c, 2*iy+py, 2*jx+px]
    x_res = x_nchw.reshape(b, c_in, hs, 2, ws, 2)
    x_res = jnp.transpose(x_res, (0, 3, 5, 1, 2, 4)).reshape(b, 4, c_in, n_pos)

    # ---- kernel C: up-sample + InstanceNorm + ReLU + gamma residual ----
    out_pm = pl.pallas_call(
        _upsample_kernel,
        grid=(b,),
        in_specs=[
            pl.BlockSpec((1, 4, 4 * cq, n_pos), lambda i: (i, 0, 0, 0)),
            pl.BlockSpec((4, c_in, 4 * cq), lambda i: (0, 0, 0)),
            pl.BlockSpec((c_in, 1), lambda i: (0, 0)),
            pl.BlockSpec((c_in, 1), lambda i: (0, 0)),
            pl.BlockSpec((c_in, 1), lambda i: (0, 0)),
            pl.BlockSpec((1, 1), lambda i: (0, 0)),
            pl.BlockSpec((1, 4, c_in, n_pos), lambda i: (i, 0, 0, 0)),
        ],
        out_specs=pl.BlockSpec((1, 4, c_in, n_pos), lambda i: (i, 0, 0, 0)),
        out_shape=jax.ShapeDtypeStruct((b, 4, c_in, n_pos), jnp.float32),
        compiler_params=par,
    )(pat, w_ph, b_up, g2, b2, gam, x_res)

    # ---- glue: un-permute phase-major output directly into NCHW ----
    out = out_pm.reshape(b, 2, 2, c_in, hs, ws)               # (b,py,px,c,iy,jx)
    out = jnp.transpose(out, (0, 3, 4, 1, 5, 2)).reshape(b, c_in, 2 * hs, 2 * ws)
    return out


# ----------------------------------------------------------------------------
# Deterministic parameter construction (shapes from the module __init__)
# ----------------------------------------------------------------------------
def make_params(key, in_channels, out_channels, kernel_size=4):
    cq = out_channels // 16
    ks = jax.random.split(key, 8)
    # NOTE: f/g/h convs consume the down-sampled feature map, which has
    # `out_channels` channels — so their weights take out_channels inputs.
    return {
        # attention_down_sample: Conv2d(in, out, 4, stride=2) + InstanceNorm affine
        "ds_w": 0.05 * jax.random.normal(
            ks[0], (out_channels, in_channels, kernel_size, kernel_size), jnp.float32),
        "ds_b": jnp.zeros((out_channels,), jnp.float32),
        "ds_in_g": jnp.ones((out_channels,), jnp.float32),
        "ds_in_b": jnp.zeros((out_channels,), jnp.float32),
        # f/g/h: Conv2d(out_channels, out//16, 1)
        "f_w": 0.2 * jax.random.normal(ks[1], (cq, out_channels, 1, 1), jnp.float32),
        "f_b": jnp.zeros((cq,), jnp.float32),
        "g_w": 0.2 * jax.random.normal(ks[2], (cq, out_channels, 1, 1), jnp.float32),
        "g_b": jnp.zeros((cq,), jnp.float32),
        "h_w": 0.2 * jax.random.normal(ks[3], (cq, out_channels, 1, 1), jnp.float32),
        "h_b": jnp.zeros((cq,), jnp.float32),
        # attention_down_upsample: ConvTranspose2d(out//16, in, 4, stride=2, pad=1)
        "us_w": 0.05 * jax.random.normal(
            ks[4], (cq, in_channels, kernel_size, kernel_size), jnp.float32),
        "us_b": jnp.zeros((in_channels,), jnp.float32),
        "us_in_g": jnp.ones((in_channels,), jnp.float32),
        "us_in_b": jnp.zeros((in_channels,), jnp.float32),
        # gamma = Parameter([0.0]) — kept exactly as the module initializes it
        "gamma": jnp.array([0.0], jnp.float32),
    }


if __name__ == "__main__":
    key = jax.random.PRNGKey(0)
    k_x, k_p = jax.random.split(key)

    B, C_IN, H, W = 2, 4, 16, 16
    C_OUT = 32                       # f/g/h project to C_OUT // 16 = 2 channels

    x = jax.random.normal(k_x, (B, C_IN, H, W), jnp.float32)    # NCHW like PyTorch
    params = make_params(k_p, C_IN, C_OUT)

    y = attention_forward(x, params)
    jax.block_until_ready(y)

    assert y.shape == (B, C_IN, H, W), y.shape
    assert bool(jnp.all(jnp.isfinite(y)))
    print("KERNEL_OK")
</pallas_src>

<mosaic_0001>
module attributes {stable_mosaic.version = 11 : i64} {
  func.func @_down_proj_kernel(%arg0: i32, %arg1: memref<1x64x64xf32, #tpu.memory_space<vmem>>, %arg2: memref<64x32xf32, #tpu.memory_space<vmem>>, %arg3: memref<1x32xf32, #tpu.memory_space<vmem>>, %arg4: memref<1x32xf32, #tpu.memory_space<vmem>>, %arg5: memref<1x32xf32, #tpu.memory_space<vmem>>, %arg6: memref<32x4xf32, #tpu.memory_space<vmem>>, %arg7: memref<1x4xf32, #tpu.memory_space<vmem>>, %arg8: memref<1x64x32xf32, #tpu.memory_space<vmem>>, %arg9: memref<1x64x4xf32, #tpu.memory_space<vmem>>) attributes {dimension_semantics = [#tpu.dimension_semantics<parallel>], iteration_bounds = array<i64: 2>, scalar_prefetch = 0 : i64, scratch_operands = 0 : i64, tpu.core_type = #tpu.core_type<tc>, window_params = [{transform_indices = @transform_0, window_bounds = array<i64: 1, 64, 64>}, {pipeline_mode = #tpu.pipeline_mode<synchronous>, transform_indices = @transform_1, window_bounds = array<i64: 64, 32>}, {pipeline_mode = #tpu.pipeline_mode<synchronous>, transform_indices = @transform_2, window_bounds = array<i64: 1, 32>}, {pipeline_mode = #tpu.pipeline_mode<synchronous>, transform_indices = @transform_3, window_bounds = array<i64: 1, 32>}, {pipeline_mode = #tpu.pipeline_mode<synchronous>, transform_indices = @transform_4, window_bounds = array<i64: 1, 32>}, {pipeline_mode = #tpu.pipeline_mode<synchronous>, transform_indices = @transform_5, window_bounds = array<i64: 32, 4>}, {pipeline_mode = #tpu.pipeline_mode<synchronous>, transform_indices = @transform_6, window_bounds = array<i64: 1, 4>}, {transform_indices = @transform_7, window_bounds = array<i64: 1, 64, 32>}, {transform_indices = @transform_8, window_bounds = array<i64: 1, 64, 4>}]} {
    %c0 = arith.constant 0 : index
    %c0_0 = arith.constant 0 : index
    %c0_1 = arith.constant 0 : index
    %0 = vector.load %arg1[%c0, %c0_0, %c0_1] : memref<1x64x64xf32, #tpu.memory_space<vmem>>, vector<1x64x64xf32>
    %1 = vector.shape_cast %0 : vector<1x64x64xf32> to vector<64x64xf32>
    %c0_2 = arith.constant 0 : index
    %c0_3 = arith.constant 0 : index
    %2 = vector.load %arg2[%c0_2, %c0_3] : memref<64x32xf32, #tpu.memory_space<vmem>>, vector<64x32xf32>
    %cst = arith.constant dense<0.000000e+00> : vector<64x32xf32>
    %3 = tpu.matmul %1, %2, %cst {dimension_numbers = #tpu.dot_dimension_numbers<[1], [0], [0], [1], [0, 0, 1, 1], [], []>} : vector<64x64xf32>, vector<64x32xf32>, vector<64x32xf32> -> vector<64x32xf32>
    %c0_4 = arith.constant 0 : index
    %c0_5 = arith.constant 0 : index
    %4 = vector.load %arg3[%c0_4, %c0_5] : memref<1x32xf32, #tpu.memory_space<vmem>>, vector<1x32xf32>
    %5 = vector.broadcast %4 : vector<1x32xf32> to vector<64x32xf32>
    %6 = arith.addf %3, %5 : vector<64x32xf32>
    %cst_6 = arith.constant dense<0.000000e+00> : vector<32xf32>
    %7 = vector.multi_reduction <add>, %6, %cst_6 [0] : vector<64x32xf32> to vector<32xf32>
    %8 = vector.shape_cast %7 : vector<32xf32> to vector<1x32xf32>
    %cst_7 = arith.constant 6.400000e+01 : f32
    %9 = vector.broadcast %cst_7 : f32 to vector<1x32xf32>
    %10 = arith.divf %8, %9 : vector<1x32xf32>
    %11 = vector.broadcast %10 : vector<1x32xf32> to vector<64x32xf32>
    %12 = arith.subf %6, %11 : vector<64x32xf32>
    %13 = arith.mulf %12, %12 : vector<64x32xf32>
    %cst_8 = arith.constant dense<0.000000e+00> : vector<32xf32>
    %14 = vector.multi_reduction <add>, %13, %cst_8 [0] : vector<64x32xf32> to vector<32xf32>
    %15 = vector.shape_cast %14 : vector<32xf32> to vector<1x32xf32>
    %cst_9 = arith.constant 6.400000e+01 : f32
    %16 = vector.broadcast %cst_9 : f32 to vector<1x32xf32>
    %17 = arith.divf %15, %16 : vector<1x32xf32>
    %18 = vector.broadcast %10 : vector<1x32xf32> to vector<64x32xf32>
    %19 = arith.subf %6, %18 : vector<64x32xf32>
    %cst_10 = arith.constant 9.99999974E-6 : f32
    %20 = vector.broadcast %cst_10 : f32 to vector<1x32xf32>
    %21 = arith.addf %17, %20 : vector<1x32xf32>
    %22 = math.rsqrt %21 : vector<1x32xf32>
    %23 = vector.broadcast %22 : vector<1x32xf32> to vector<64x32xf32>
    %24 = arith.mulf %19, %23 : vector<64x32xf32>
    %c0_11 = arith.constant 0 : index
    %c0_12 = arith.constant 0 : index
    %25 = vector.load %arg4[%c0_11, %c0_12] : memref<1x32xf32, #tpu.memory_space<vmem>>, vector<1x32xf32>
    %26 = vector.broadcast %25 : vector<1x32xf32> to vector<64x32xf32>
    %27 = arith.mulf %24, %26 : vector<64x32xf32>
    %c0_13 = arith.constant 0 : index
    %c0_14 = arith.constant 0 : index
    %28 = vector.load %arg5[%c0_13, %c0_14] : memref<1x32xf32, #tpu.memory_space<vmem>>, vector<1x32xf32>
    %29 = vector.broadcast %28 : vector<1x32xf32> to vector<64x32xf32>
    %30 = arith.addf %27, %29 : vector<64x32xf32>
    %cst_15 = arith.constant 0.000000e+00 : f32
    %31 = vector.broadcast %cst_15 : f32 to vector<64x32xf32>
    %32 = arith.maximumf %30, %31 : vector<64x32xf32>
    %c0_16 = arith.constant 0 : index
    %c0_17 = arith.constant 0 : index
    %c0_18 = arith.constant 0 : index
    %33 = vector.load %arg8[%c0_16, %c0_17, %c0_18] : memref<1x64x32xf32, #tpu.memory_space<vmem>>, vector<1x64x32xf32>
    %34 = vector.shape_cast %33 : vector<1x64x32xf32> to vector<64x32xf32>
    %35 = vector.shape_cast %32 : vector<64x32xf32> to vector<1x64x32xf32>
    tpu.vector_store %arg8[%c0_16, %c0_17, %c0_18], %35 {strides = array<i32>} : memref<1x64x32xf32, #tpu.memory_space<vmem>>, vector<1x64x32xf32>,
    %c0_19 = arith.constant 0 : index
    %c0_20 = arith.constant 0 : index
    %36 = vector.load %arg6[%c0_19, %c0_20] : memref<32x4xf32, #tpu.memory_space<vmem>>, vector<32x4xf32>
    %cst_21 = arith.constant dense<0.000000e+00> : vector<64x4xf32>
    %37 = tpu.matmul %32, %36, %cst_21 {dimension_numbers = #tpu.dot_dimension_numbers<[1], [0], [0], [1], [0, 0, 1, 1], [], []>} : vector<64x32xf32>, vector<32x4xf32>, vector<64x4xf32> -> vector<64x4xf32>
    %c0_22 = arith.constant 0 : index
    %c0_23 = arith.constant 0 : index
    %38 = vector.load %arg7[%c0_22, %c0_23] : memref<1x4xf32, #tpu.memory_space<vmem>>, vector<1x4xf32>
    %39 = vector.broadcast %38 : vector<1x4xf32> to vector<64x4xf32>
    %40 = arith.addf %37, %39 : vector<64x4xf32>
    %c0_24 = arith.constant 0 : index
    %c0_25 = arith.constant 0 : index
    %c0_26 = arith.constant 0 : index
    %41 = vector.load %arg9[%c0_24, %c0_25, %c0_26] : memref<1x64x4xf32, #tpu.memory_space<vmem>>, vector<1x64x4xf32>
    %42 = vector.shape_cast %41 : vector<1x64x4xf32> to vector<64x4xf32>
    %43 = vector.shape_cast %40 : vector<64x4xf32> to vector<1x64x4xf32>
    tpu.vector_store %arg9[%c0_24, %c0_25, %c0_26], %43 {strides = array<i32>} : memref<1x64x4xf32, #tpu.memory_space<vmem>>, vector<1x64x4xf32>,
    return
  }
  func.func @transform_0(%arg0: i32) -> (i32, i32, i32) {
    %c0_i32 = arith.constant 0 : i32
    %c0_i32_0 = arith.constant 0 : i32
    %c0_i32_1 = arith.constant 0 : i32
    return %arg0, %c0_i32, %c0_i32_0 : i32, i32, i32
  }
  func.func @transform_1(%arg0: i32) -> (i32, i32) {
    %c0_i32 = arith.constant 0 : i32
    %c0_i32_0 = arith.constant 0 : i32
    %c0_i32_1 = arith.constant 0 : i32
    return %c0_i32, %c0_i32_0 : i32, i32
  }
  func.func @transform_2(%arg0: i32) -> (i32, i32) {
    %c0_i32 = arith.constant 0 : i32
    %c0_i32_0 = arith.constant 0 : i32
    %c0_i32_1 = arith.constant 0 : i32
    return %c0_i32, %c0_i32_0 : i32, i32
  }
  func.func @transform_3(%arg0: i32) -> (i32, i32) {
    %c0_i32 = arith.constant 0 : i32
    %c0_i32_0 = arith.constant 0 : i32
    %c0_i32_1 = arith.constant 0 : i32
    return %c0_i32, %c0_i32_0 : i32, i32
  }
  func.func @transform_4(%arg0: i32) -> (i32, i32) {
    %c0_i32 = arith.constant 0 : i32
    %c0_i32_0 = arith.constant 0 : i32
    %c0_i32_1 = arith.constant 0 : i32
    return %c0_i32, %c0_i32_0 : i32, i32
  }
  func.func @transform_5(%arg0: i32) -> (i32, i32) {
    %c0_i32 = arith.constant 0 : i32
    %c0_i32_0 = arith.constant 0 : i32
    %c0_i32_1 = arith.constant 0 : i32
    return %c0_i32, %c0_i32_0 : i32, i32
  }
  func.func @transform_6(%arg0: i32) -> (i32, i32) {
    %c0_i32 = arith.constant 0 : i32
    %c0_i32_0 = arith.constant 0 : i32
    %c0_i32_1 = arith.constant 0 : i32
    return %c0_i32, %c0_i32_0 : i32, i32
  }
  func.func @transform_7(%arg0: i32) -> (i32, i32, i32) {
    %c0_i32 = arith.constant 0 : i32
    %c0_i32_0 = arith.constant 0 : i32
    %c0_i32_1 = arith.constant 0 : i32
    return %arg0, %c0_i32, %c0_i32_0 : i32, i32, i32
  }
  func.func @transform_8(%arg0: i32) -> (i32, i32, i32) {
    %c0_i32 = arith.constant 0 : i32
    %c0_i32_0 = arith.constant 0 : i32
    %c0_i32_1 = arith.constant 0 : i32
    return %arg0, %c0_i32, %c0_i32_0 : i32, i32, i32
  }
}

module attributes {stable_mosaic.version = 11 : i64} {
  func.func @_attn_kernel(%arg0: i32, %arg1: memref<1x64x32xf32, #tpu.memory_space<vmem>>, %arg2: memref<1x2x16xf32, #tpu.memory_space<vmem>>, %arg3: memref<1x16x2xf32, #tpu.memory_space<vmem>>, %arg4: memref<32x2xf32, #tpu.memory_space<vmem>>, %arg5: memref<1x2xf32, #tpu.memory_space<vmem>>, %arg6: memref<1x64x2xf32, #tpu.memory_space<vmem>>) attributes {dimension_semantics = [#tpu.dimension_semantics<parallel>], iteration_bounds = array<i64: 2>, scalar_prefetch = 0 : i64, scratch_operands = 0 : i64, tpu.core_type = #tpu.core_type<tc>, window_params = [{transform_indices = @transform_0, window_bounds = array<i64: 1, 64, 32>}, {transform_indices = @transform_1, window_bounds = array<i64: 1, 2, 16>}, {transform_indices = @transform_2, window_bounds = array<i64: 1, 16, 2>}, {pipeline_mode = #tpu.pipeline_mode<synchronous>, transform_indices = @transform_3, window_bounds = array<i64: 32, 2>}, {pipeline_mode = #tpu.pipeline_mode<synchronous>, transform_indices = @transform_4, window_bounds = array<i64: 1, 2>}, {transform_indices = @transform_5, window_bounds = array<i64: 1, 64, 2>}]} {
    %c0 = arith.constant 0 : index
    %c0_0 = arith.constant 0 : index
    %c0_1 = arith.constant 0 : index
    %0 = vector.load %arg2[%c0, %c0_0, %c0_1] : memref<1x2x16xf32, #tpu.memory_space<vmem>>, vector<1x2x16xf32>
    %1 = vector.shape_cast %0 : vector<1x2x16xf32> to vector<2x16xf32>
    %c0_2 = arith.constant 0 : index
    %c0_3 = arith.constant 0 : index
    %2 = vector.load %arg4[%c0_2, %c0_3] : memref<32x2xf32, #tpu.memory_space<vmem>>, vector<32x2xf32>
    %cst = arith.constant dense<0.000000e+00> : vector<32x16xf32>
    %3 = tpu.matmul %2, %1, %cst {dimension_numbers = #tpu.dot_dimension_numbers<[1], [0], [0], [1], [0, 0, 1, 1], [], []>} : vector<32x2xf32>, vector<2x16xf32>, vector<32x16xf32> -> vector<32x16xf32>
    %c0_4 = arith.constant 0 : index
    %c0_5 = arith.constant 0 : index
    %4 = vector.load %arg5[%c0_4, %c0_5] : memref<1x2xf32, #tpu.memory_space<vmem>>, vector<1x2xf32>
    %cst_6 = arith.constant dense<0.000000e+00> : vector<1x16xf32>
    %5 = tpu.matmul %4, %1, %cst_6 {dimension_numbers = #tpu.dot_dimension_numbers<[1], [0], [0], [1], [0, 0, 1, 1], [], []>} : vector<1x2xf32>, vector<2x16xf32>, vector<1x16xf32> -> vector<1x16xf32>
    %c0_7 = arith.constant 0 : index
    %c0_8 = arith.constant 0 : index
    %c0_9 = arith.constant 0 : index
    %6 = vector.load %arg1[%c0_7, %c0_8, %c0_9] : memref<1x64x32xf32, #tpu.memory_space<vmem>>, vector<1x64x32xf32>
    %7 = vector.shape_cast %6 : vector<1x64x32xf32> to vector<64x32xf32>
    %cst_10 = arith.constant dense<0.000000e+00> : vector<64x16xf32>
    %8 = tpu.matmul %7, %3, %cst_10 {dimension_numbers = #tpu.dot_dimension_numbers<[1], [0], [0], [1], [0, 0, 1, 1], [], []>} : vector<64x32xf32>, vector<32x16xf32>, vector<64x16xf32> -> vector<64x16xf32>
    %9 = vector.broadcast %5 : vector<1x16xf32> to vector<64x16xf32>
    %10 = arith.addf %8, %9 : vector<64x16xf32>
    %cst_11 = arith.constant dense<0xFF800000> : vector<64xf32>
    %11 = vector.multi_reduction <maximumf>, %10, %cst_11 [1] : vector<64x16xf32> to vector<64xf32>
    %12 = vector.shape_cast %11 : vector<64xf32> to vector<64x1xf32>
    %13 = vector.broadcast %12 : vector<64x1xf32> to vector<64x16xf32>
    %14 = arith.subf %10, %13 : vector<64x16xf32>
    %15 = math.exp %14 : vector<64x16xf32>
    %cst_12 = arith.constant dense<0.000000e+00> : vector<64xf32>
    %16 = vector.multi_reduction <add>, %15, %cst_12 [1] : vector<64x16xf32> to vector<64xf32>
    %17 = vector.shape_cast %16 : vector<64xf32> to vector<64x1xf32>
    %c0_13 = arith.constant 0 : index
    %c0_14 = arith.constant 0 : index
    %c0_15 = arith.constant 0 : index
    %18 = vector.load %arg3[%c0_13, %c0_14, %c0_15] : memref<1x16x2xf32, #tpu.memory_space<vmem>>, vector<1x16x2xf32>
    %19 = vector.shape_cast %18 : vector<1x16x2xf32> to vector<16x2xf32>
    %cst_16 = arith.constant dense<0.000000e+00> : vector<64x2xf32>
    %20 = tpu.matmul %15, %19, %cst_16 {dimension_numbers = #tpu.dot_dimension_numbers<[1], [0], [0], [1], [0, 0, 1, 1], [], []>} : vector<64x16xf32>, vector<16x2xf32>, vector<64x2xf32> -> vector<64x2xf32>
    %21 = tpu.reciprocal %17 {approx = true} : vector<64x1xf32> -> vector<64x1xf32>
    %22 = vector.broadcast %21 : vector<64x1xf32> to vector<64x2xf32>
    %23 = arith.mulf %20, %22 : vector<64x2xf32>
    %c0_17 = arith.constant 0 : index
    %c0_18 = arith.constant 0 : index
    %c0_19 = arith.constant 0 : index
    %24 = vector.load %arg6[%c0_17, %c0_18, %c0_19] : memref<1x64x2xf32, #tpu.memory_space<vmem>>, vector<1x64x2xf32>
    %25 = vector.shape_cast %24 : vector<1x64x2xf32> to vector<64x2xf32>
    %26 = vector.shape_cast %23 : vector<64x2xf32> to vector<1x64x2xf32>
    tpu.vector_store %arg6[%c0_17, %c0_18, %c0_19], %26 {strides = array<i32>} : memref<1x64x2xf32, #tpu.memory_space<vmem>>, vector<1x64x2xf32>,
    return
  }
  func.func @transform_0(%arg0: i32) -> (i32, i32, i32) {
    %c0_i32 = arith.constant 0 : i32
    %c0_i32_0 = arith.constant 0 : i32
    %c0_i32_1 = arith.constant 0 : i32
    return %arg0, %c0_i32, %c0_i32_0 : i32, i32, i32
  }
  func.func @transform_1(%arg0: i32) -> (i32, i32, i32) {
    %c0_i32 = arith.constant 0 : i32
    %c0_i32_0 = arith.constant 0 : i32
    %c0_i32_1 = arith.constant 0 : i32
    return %arg0, %c0_i32, %c0_i32_0 : i32, i32, i32
  }
  func.func @transform_2(%arg0: i32) -> (i32, i32, i32) {
    %c0_i32 = arith.constant 0 : i32
    %c0_i32_0 = arith.constant 0 : i32
    %c0_i32_1 = arith.constant 0 : i32
    return %arg0, %c0_i32, %c0_i32_0 : i32, i32, i32
  }
  func.func @transform_3(%arg0: i32) -> (i32, i32) {
    %c0_i32 = arith.constant 0 : i32
    %c0_i32_0 = arith.constant 0 : i32
    %c0_i32_1 = arith.constant 0 : i32
    return %c0_i32, %c0_i32_0 : i32, i32
  }
  func.func @transform_4(%arg0: i32) -> (i32, i32) {
    %c0_i32 = arith.constant 0 : i32
    %c0_i32_0 = arith.constant 0 : i32
    %c0_i32_1 = arith.constant 0 : i32
    return %c0_i32, %c0_i32_0 : i32, i32
  }
  func.func @transform_5(%arg0: i32) -> (i32, i32, i32) {
    %c0_i32 = arith.constant 0 : i32
    %c0_i32_0 = arith.constant 0 : i32
    %c0_i32_1 = arith.constant 0 : i32
    return %arg0, %c0_i32, %c0_i32_0 : i32, i32, i32
  }
}

module attributes {stable_mosaic.version = 11 : i64} {
  func.func @_upsample_kernel(%arg0: i32, %arg1: memref<1x4x8x64xf32, #tpu.memory_space<vmem>>, %arg2: memref<4x4x8xf32, #tpu.memory_space<vmem>>, %arg3: memref<4x1xf32, #tpu.memory_space<vmem>>, %arg4: memref<4x1xf32, #tpu.memory_space<vmem>>, %arg5: memref<4x1xf32, #tpu.memory_space<vmem>>, %arg6: memref<1x1xf32, #tpu.memory_space<vmem>>, %arg7: memref<1x4x4x64xf32, #tpu.memory_space<vmem>>, %arg8: memref<1x4x4x64xf32, #tpu.memory_space<vmem>>) attributes {dimension_semantics = [#tpu.dimension_semantics<parallel>], iteration_bounds = array<i64: 2>, scalar_prefetch = 0 : i64, scratch_operands = 0 : i64, tpu.core_type = #tpu.core_type<tc>, window_params = [{transform_indices = @transform_0, window_bounds = array<i64: 1, 4, 8, 64>}, {pipeline_mode = #tpu.pipeline_mode<synchronous>, transform_indices = @transform_1, window_bounds = array<i64: 4, 4, 8>}, {pipeline_mode = #tpu.pipeline_mode<synchronous>, transform_indices = @transform_2, window_bounds = array<i64: 4, 1>}, {pipeline_mode = #tpu.pipeline_mode<synchronous>, transform_indices = @transform_3, window_bounds = array<i64: 4, 1>}, {pipeline_mode = #tpu.pipeline_mode<synchronous>, transform_indices = @transform_4, window_bounds = array<i64: 4, 1>}, {pipeline_mode = #tpu.pipeline_mode<synchronous>, transform_indices = @transform_5, window_bounds = array<i64: 1, 1>}, {transform_indices = @transform_6, window_bounds = array<i64: 1, 4, 4, 64>}, {transform_indices = @transform_7, window_bounds = array<i64: 1, 4, 4, 64>}]} {
    %c0 = arith.constant 0 : index
    %c0_0 = arith.constant 0 : index
    %c0_1 = arith.constant 0 : index
    %0 = vector.load %arg2[%c0, %c0_0, %c0_1] : memref<4x4x8xf32, #tpu.memory_space<vmem>>, vector<1x4x8xf32>
    %1 = vector.shape_cast %0 : vector<1x4x8xf32> to vector<4x8xf32>
    %c0_2 = arith.constant 0 : index
    %c0_3 = arith.constant 0 : index
    %c0_4 = arith.constant 0 : index
    %c0_5 = arith.constant 0 : index
    %2 = vector.load %arg1[%c0_2, %c0_3, %c0_4, %c0_5] : memref<1x4x8x64xf32, #tpu.memory_space<vmem>>, vector<1x1x8x64xf32>
    %3 = vector.shape_cast %2 : vector<1x1x8x64xf32> to vector<8x64xf32>
    %cst = arith.constant dense<0.000000e+00> : vector<4x64xf32>
    %4 = tpu.matmul %1, %3, %cst {dimension_numbers = #tpu.dot_dimension_numbers<[1], [0], [0], [1], [0, 0, 1, 1], [], []>} : vector<4x8xf32>, vector<8x64xf32>, vector<4x64xf32> -> vector<4x64xf32>
    %c0_6 = arith.constant 0 : index
    %c0_7 = arith.constant 0 : index
    %5 = vector.load %arg3[%c0_6, %c0_7] : memref<4x1xf32, #tpu.memory_space<vmem>>, vector<4x1xf32>
    %6 = vector.broadcast %5 : vector<4x1xf32> to vector<4x64xf32>
    %7 = arith.addf %4, %6 : vector<4x64xf32>
    %c1 = arith.constant 1 : index
    %c0_8 = arith.constant 0 : index
    %c0_9 = arith.constant 0 : index
    %8 = vector.load %arg2[%c1, %c0_8, %c0_9] : memref<4x4x8xf32, #tpu.memory_space<vmem>>, vector<1x4x8xf32>
    %9 = vector.shape_cast %8 : vector<1x4x8xf32> to vector<4x8xf32>
    %c0_10 = arith.constant 0 : index
    %c1_11 = arith.constant 1 : index
    %c0_12 = arith.constant 0 : index
    %c0_13 = arith.constant 0 : index
    %10 = vector.load %arg1[%c0_10, %c1_11, %c0_12, %c0_13] : memref<1x4x8x64xf32, #tpu.memory_space<vmem>>, vector<1x1x8x64xf32>
    %11 = vector.shape_cast %10 : vector<1x1x8x64xf32> to vector<8x64xf32>
    %cst_14 = arith.constant dense<0.000000e+00> : vector<4x64xf32>
    %12 = tpu.matmul %9, %11, %cst_14 {dimension_numbers = #tpu.dot_dimension_numbers<[1], [0], [0], [1], [0, 0, 1, 1], [], []>} : vector<4x8xf32>, vector<8x64xf32>, vector<4x64xf32> -> vector<4x64xf32>
    %c0_15 = arith.constant 0 : index
    %c0_16 = arith.constant 0 : index
    %13 = vector.load %arg3[%c0_15, %c0_16] : memref<4x1xf32, #tpu.memory_space<vmem>>, vector<4x1xf32>
    %14 = vector.broadcast %13 : vector<4x1xf32> to vector<4x64xf32>
    %15 = arith.addf %12, %14 : vector<4x64xf32>
    %c2 = arith.constant 2 : index
    %c0_17 = arith.constant 0 : index
    %c0_18 = arith.constant 0 : index
    %16 = vector.load %arg2[%c2, %c0_17, %c0_18] : memref<4x4x8xf32, #tpu.memory_space<vmem>>, vector<1x4x8xf32>
    %17 = vector.shape_cast %16 : vector<1x4x8xf32> to vector<4x8xf32>
    %c0_19 = arith.constant 0 : index
    %c2_20 = arith.constant 2 : index
    %c0_21 = arith.constant 0 : index
    %c0_22 = arith.constant 0 : index
    %18 = vector.load %arg1[%c0_19, %c2_20, %c0_21, %c0_22] : memref<1x4x8x64xf32, #tpu.memory_space<vmem>>, vector<1x1x8x64xf32>
    %19 = vector.shape_cast %18 : vector<1x1x8x64xf32> to vector<8x64xf32>
    %cst_23 = arith.constant dense<0.000000e+00> : vector<4x64xf32>
    %20 = tpu.matmul %17, %19, %cst_23 {dimension_numbers = #tpu.dot_dimension_numbers<[1], [0], [0], [1], [0, 0, 1, 1], [], []>} : vector<4x8xf32>, vector<8x64xf32>, vector<4x64xf32> -> vector<4x64xf32>
    %c0_24 = arith.constant 0 : index
    %c0_25 = arith.constant 0 : index
    %21 = vector.load %arg3[%c0_24, %c0_25] : memref<4x1xf32, #tpu.memory_space<vmem>>, vector<4x1xf32>
    %22 = vector.broadcast %21 : vector<4x1xf32> to vector<4x64xf32>
    %23 = arith.addf %20, %22 : vector<4x64xf32>
    %c3 = arith.constant 3 : index
    %c0_26 = arith.constant 0 : index
    %c0_27 = arith.constant 0 : index
    %24 = vector.load %arg2[%c3, %c0_26, %c0_27] : memref<4x4x8xf32, #tpu.memory_space<vmem>>, vector<1x4x8xf32>
    %25 = vector.shape_cast %24 : vector<1x4x8xf32> to vector<4x8xf32>
    %c0_28 = arith.constant 0 : index
    %c3_29 = arith.constant 3 : index
    %c0_30 = arith.constant 0 : index
    %c0_31 = arith.constant 0 : index
    %26 = vector.load %arg1[%c0_28, %c3_29, %c0_30, %c0_31] : memref<1x4x8x64xf32, #tpu.memory_space<vmem>>, vector<1x1x8x64xf32>
    %27 = vector.shape_cast %26 : vector<1x1x8x64xf32> to vector<8x64xf32>
    %cst_32 = arith.constant dense<0.000000e+00> : vector<4x64xf32>
    %28 = tpu.matmul %25, %27, %cst_32 {dimension_numbers = #tpu.dot_dimension_numbers<[1], [0], [0], [1], [0, 0, 1, 1], [], []>} : vector<4x8xf32>, vector<8x64xf32>, vector<4x64xf32> -> vector<4x64xf32>
    %c0_33 = arith.constant 0 : index
    %c0_34 = arith.constant 0 : index
    %29 = vector.load %arg3[%c0_33, %c0_34] : memref<4x1xf32, #tpu.memory_space<vmem>>, vector<4x1xf32>
    %30 = vector.broadcast %29 : vector<4x1xf32> to vector<4x64xf32>
    %31 = arith.addf %28, %30 : vector<4x64xf32>
    %cst_35 = arith.constant dense<0.000000e+00> : vector<4xf32>
    %32 = vector.multi_reduction <add>, %7, %cst_35 [1] : vector<4x64xf32> to vector<4xf32>
    %33 = vector.shape_cast %32 : vector<4xf32> to vector<4x1xf32>
    %cst_36 = arith.constant 0.000000e+00 : f32
    %34 = vector.broadcast %cst_36 : f32 to vector<4x1xf32>
    %35 = arith.addf %34, %33 : vector<4x1xf32>
    %cst_37 = arith.constant dense<0.000000e+00> : vector<4xf32>
    %36 = vector.multi_reduction <add>, %15, %cst_37 [1] : vector<4x64xf32> to vector<4xf32>
    %37 = vector.shape_cast %36 : vector<4xf32> to vector<4x1xf32>
    %38 = arith.addf %35, %37 : vector<4x1xf32>
    %cst_38 = arith.constant dense<0.000000e+00> : vector<4xf32>
    %39 = vector.multi_reduction <add>, %23, %cst_38 [1] : vector<4x64xf32> to vector<4xf32>
    %40 = vector.shape_cast %39 : vector<4xf32> to vector<4x1xf32>
    %41 = arith.addf %38, %40 : vector<4x1xf32>
    %cst_39 = arith.constant dense<0.000000e+00> : vector<4xf32>
    %42 = vector.multi_reduction <add>, %31, %cst_39 [1] : vector<4x64xf32> to vector<4xf32>
    %43 = vector.shape_cast %42 : vector<4xf32> to vector<4x1xf32>
    %44 = arith.addf %41, %43 : vector<4x1xf32>
    %cst_40 = arith.constant 3.906250e-03 : f32
    %45 = vector.broadcast %cst_40 : f32 to vector<4x1xf32>
    %46 = arith.mulf %44, %45 : vector<4x1xf32>
    %47 = vector.broadcast %46 : vector<4x1xf32> to vector<4x64xf32>
    %48 = arith.subf %7, %47 : vector<4x64xf32>
    %49 = arith.mulf %48, %48 : vector<4x64xf32>
    %cst_41 = arith.constant dense<0.000000e+00> : vector<4xf32>
    %50 = vector.multi_reduction <add>, %49, %cst_41 [1] : vector<4x64xf32> to vector<4xf32>
    %51 = vector.shape_cast %50 : vector<4xf32> to vector<4x1xf32>
    %cst_42 = arith.constant 0.000000e+00 : f32
    %52 = vector.broadcast %cst_42 : f32 to vector<4x1xf32>
    %53 = arith.addf %52, %51 : vector<4x1xf32>
    %54 = vector.broadcast %46 : vector<4x1xf32> to vector<4x64xf32>
    %55 = arith.subf %15, %54 : vector<4x64xf32>
    %56 = arith.mulf %55, %55 : vector<4x64xf32>
    %cst_43 = arith.constant dense<0.000000e+00> : vector<4xf32>
    %57 = vector.multi_reduction <add>, %56, %cst_43 [1] : vector<4x64xf32> to vector<4xf32>
    %58 = vector.shape_cast %57 : vector<4xf32> to vector<4x1xf32>
    %59 = arith.addf %53, %58 : vector<4x1xf32>
    %60 = vector.broadcast %46 : vector<4x1xf32> to vector<4x64xf32>
    %61 = arith.subf %23, %60 : vector<4x64xf32>
    %62 = arith.mulf %61, %61 : vector<4x64xf32>
    %cst_44 = arith.constant dense<0.000000e+00> : vector<4xf32>
    %63 = vector.multi_reduction <add>, %62, %cst_44 [1] : vector<4x64xf32> to vector<4xf32>
    %64 = vector.shape_cast %63 : vector<4xf32> to vector<4x1xf32>
    %65 = arith.addf %59, %64 : vector<4x1xf32>
    %66 = vector.broadcast %46 : vector<4x1xf32> to vector<4x64xf32>
    %67 = arith.subf %31, %66 : vector<4x64xf32>
    %68 = arith.mulf %67, %67 : vector<4x64xf32>
    %cst_45 = arith.constant dense<0.000000e+00> : vector<4xf32>
    %69 = vector.multi_reduction <add>, %68, %cst_45 [1] : vector<4x64xf32> to vector<4xf32>
    %70 = vector.shape_cast %69 : vector<4xf32> to vector<4x1xf32>
    %71 = arith.addf %65, %70 : vector<4x1xf32>
    %cst_46 = arith.constant 3.906250e-03 : f32
    %72 = vector.broadcast %cst_46 : f32 to vector<4x1xf32>
    %73 = arith.mulf %71, %72 : vector<4x1xf32>
    %cst_47 = arith.constant 9.99999974E-6 : f32
    %74 = vector.broadcast %cst_47 : f32 to vector<4x1xf32>
    %75 = arith.addf %73, %74 : vector<4x1xf32>
    %76 = math.rsqrt %75 : vector<4x1xf32>
    %c0_48 = arith.constant 0 : index
    %c0_49 = arith.constant 0 : index
    %77 = vector.load %arg6[%c0_48, %c0_49] : memref<1x1xf32, #tpu.memory_space<vmem>>, vector<1x1xf32>
    %78 = vector.broadcast %46 : vector<4x1xf32> to vector<4x64xf32>
    %79 = arith.subf %7, %78 : vector<4x64xf32>
    %80 = vector.broadcast %76 : vector<4x1xf32> to vector<4x64xf32>
    %81 = arith.mulf %79, %80 : vector<4x64xf32>
    %c0_50 = arith.constant 0 : index
    %c0_51 = arith.constant 0 : index
    %82 = vector.load %arg4[%c0_50, %c0_51] : memref<4x1xf32, #tpu.memory_space<vmem>>, vector<4x1xf32>
    %83 = vector.broadcast %82 : vector<4x1xf32> to vector<4x64xf32>
    %84 = arith.mulf %81, %83 : vector<4x64xf32>
    %c0_52 = arith.constant 0 : index
    %c0_53 = arith.constant 0 : index
    %85 = vector.load %arg5[%c0_52, %c0_53] : memref<4x1xf32, #tpu.memory_space<vmem>>, vector<4x1xf32>
    %86 = vector.broadcast %85 : vector<4x1xf32> to vector<4x64xf32>
    %87 = arith.addf %84, %86 : vector<4x64xf32>
    %cst_54 = arith.constant 0.000000e+00 : f32
    %88 = vector.broadcast %cst_54 : f32 to vector<4x64xf32>
    %89 = arith.maximumf %87, %88 : vector<4x64xf32>
    %90 = vector.broadcast %77 : vector<1x1xf32> to vector<4x64xf32>
    %91 = arith.mulf %90, %89 : vector<4x64xf32>
    %c0_55 = arith.constant 0 : index
    %c0_56 = arith.constant 0 : index
    %c0_57 = arith.constant 0 : index
    %c0_58 = arith.constant 0 : index
    %92 = vector.load %arg7[%c0_55, %c0_56, %c0_57, %c0_58] : memref<1x4x4x64xf32, #tpu.memory_space<vmem>>, vector<1x1x4x64xf32>
    %93 = vector.shape_cast %92 : vector<1x1x4x64xf32> to vector<4x64xf32>
    %94 = arith.addf %91, %93 : vector<4x64xf32>
    %c0_59 = arith.constant 0 : index
    %c0_60 = arith.constant 0 : index
    %c0_61 = arith.constant 0 : index
    %c0_62 = arith.constant 0 : index
    %95 = vector.load %arg8[%c0_59, %c0_60, %c0_61, %c0_62] : memref<1x4x4x64xf32, #tpu.memory_space<vmem>>, vector<1x1x4x64xf32>
    %96 = vector.shape_cast %95 : vector<1x1x4x64xf32> to vector<4x64xf32>
    %97 = vector.shape_cast %94 : vector<4x64xf32> to vector<1x1x4x64xf32>
    tpu.vector_store %arg8[%c0_59, %c0_60, %c0_61, %c0_62], %97 {strides = array<i32>} : memref<1x4x4x64xf32, #tpu.memory_space<vmem>>, vector<1x1x4x64xf32>,
    %98 = vector.broadcast %46 : vector<4x1xf32> to vector<4x64xf32>
    %99 = arith.subf %15, %98 : vector<4x64xf32>
    %100 = vector.broadcast %76 : vector<4x1xf32> to vector<4x64xf32>
    %101 = arith.mulf %99, %100 : vector<4x64xf32>
    %c0_63 = arith.constant 0 : index
    %c0_64 = arith.constant 0 : index
    %102 = vector.load %arg4[%c0_63, %c0_64] : memref<4x1xf32, #tpu.memory_space<vmem>>, vector<4x1xf32>
    %103 = vector.broadcast %102 : vector<4x1xf32> to vector<4x64xf32>
    %104 = arith.mulf %101, %103 : vector<4x64xf32>
    %c0_65 = arith.constant 0 : index
    %c0_66 = arith.constant 0 : index
    %105 = vector.load %arg5[%c0_65, %c0_66] : memref<4x1xf32, #tpu.memory_space<vmem>>, vector<4x1xf32>
    %106 = vector.broadcast %105 : vector<4x1xf32> to vector<4x64xf32>
    %107 = arith.addf %104, %106 : vector<4x64xf32>
    %cst_67 = arith.constant 0.000000e+00 : f32
    %108 = vector.broadcast %cst_67 : f32 to vector<4x64xf32>
    %109 = arith.maximumf %107, %108 : vector<4x64xf32>
    %110 = vector.broadcast %77 : vector<1x1xf32> to vector<4x64xf32>
    %111 = arith.mulf %110, %109 : vector<4x64xf32>
    %c0_68 = arith.constant 0 : index
    %c1_69 = arith.constant 1 : index
    %c0_70 = arith.constant 0 : index
    %c0_71 = arith.constant 0 : index
    %112 = vector.load %arg7[%c0_68, %c1_69, %c0_70, %c0_71] : memref<1x4x4x64xf32, #tpu.memory_space<vmem>>, vector<1x1x4x64xf32>
    %113 = vector.shape_cast %112 : vector<1x1x4x64xf32> to vector<4x64xf32>
    %114 = arith.addf %111, %113 : vector<4x64xf32>
    %c0_72 = arith.constant 0 : index
    %c1_73 = arith.constant 1 : index
    %c0_74 = arith.constant 0 : index
    %c0_75 = arith.constant 0 : index
    %115 = vector.load %arg8[%c0_72, %c1_73, %c0_74, %c0_75] : memref<1x4x4x64xf32, #tpu.memory_space<vmem>>, vector<1x1x4x64xf32>
    %116 = vector.shape_cast %115 : vector<1x1x4x64xf32> to vector<4x64xf32>
    %117 = vector.shape_cast %114 : vector<4x64xf32> to vector<1x1x4x64xf32>
    tpu.vector_store %arg8[%c0_72, %c1_73, %c0_74, %c0_75], %117 {strides = array<i32>} : memref<1x4x4x64xf32, #tpu.memory_space<vmem>>, vector<1x1x4x64xf32>,
    %118 = vector.broadcast %46 : vector<4x1xf32> to vector<4x64xf32>
    %119 = arith.subf %23, %118 : vector<4x64xf32>
    %120 = vector.broadcast %76 : vector<4x1xf32> to vector<4x64xf32>
    %121 = arith.mulf %119, %120 : vector<4x64xf32>
    %c0_76 = arith.constant 0 : index
    %c0_77 = arith.constant 0 : index
    %122 = vector.load %arg4[%c0_76, %c0_77] : memref<4x1xf32, #tpu.memory_space<vmem>>, vector<4x1xf32>
    %123 = vector.broadcast %122 : vector<4x1xf32> to vector<4x64xf32>
    %124 = arith.mulf %121, %123 : vector<4x64xf32>
    %c0_78 = arith.constant 0 : index
    %c0_79 = arith.constant 0 : index
    %125 = vector.load %arg5[%c0_78, %c0_79] : memref<4x1xf32, #tpu.memory_space<vmem>>, vector<4x1xf32>
    %126 = vector.broadcast %125 : vector<4x1xf32> to vector<4x64xf32>
    %127 = arith.addf %124, %126 : vector<4x64xf32>
    %cst_80 = arith.constant 0.000000e+00 : f32
    %128 = vector.broadcast %cst_80 : f32 to vector<4x64xf32>
    %129 = arith.maximumf %127, %128 : vector<4x64xf32>
    %130 = vector.broadcast %77 : vector<1x1xf32> to vector<4x64xf32>
    %131 = arith.mulf %130, %129 : vector<4x64xf32>
    %c0_81 = arith.constant 0 : index
    %c2_82 = arith.constant 2 : index
    %c0_83 = arith.constant 0 : index
    %c0_84 = arith.constant 0 : index
    %132 = vector.load %arg7[%c0_81, %c2_82, %c0_83, %c0_84] : memref<1x4x4x64xf32, #tpu.memory_space<vmem>>, vector<1x1x4x64xf32>
    %133 = vector.shape_cast %132 : vector<1x1x4x64xf32> to vector<4x64xf32>
    %134 = arith.addf %131, %133 : vector<4x64xf32>
    %c0_85 = arith.constant 0 : index
    %c2_86 = arith.constant 2 : index
    %c0_87 = arith.constant 0 : index
    %c0_88 = arith.constant 0 : index
    %135 = vector.load %arg8[%c0_85, %c2_86, %c0_87, %c0_88] : memref<1x4x4x64xf32, #tpu.memory_space<vmem>>, vector<1x1x4x64xf32>
    %136 = vector.shape_cast %135 : vector<1x1x4x64xf32> to vector<4x64xf32>
    %137 = vector.shape_cast %134 : vector<4x64xf32> to vector<1x1x4x64xf32>
    tpu.vector_store %arg8[%c0_85, %c2_86, %c0_87, %c0_88], %137 {strides = array<i32>} : memref<1x4x4x64xf32, #tpu.memory_space<vmem>>, vector<1x1x4x64xf32>,
    %138 = vector.broadcast %46 : vector<4x1xf32> to vector<4x64xf32>
    %139 = arith.subf %31, %138 : vector<4x64xf32>
    %140 = vector.broadcast %76 : vector<4x1xf32> to vector<4x64xf32>
    %141 = arith.mulf %139, %140 : vector<4x64xf32>
    %c0_89 = arith.constant 0 : index
    %c0_90 = arith.constant 0 : index
    %142 = vector.load %arg4[%c0_89, %c0_90] : memref<4x1xf32, #tpu.memory_space<vmem>>, vector<4x1xf32>
    %143 = vector.broadcast %142 : vector<4x1xf32> to vector<4x64xf32>
    %144 = arith.mulf %141, %143 : vector<4x64xf32>
    %c0_91 = arith.constant 0 : index
    %c0_92 = arith.constant 0 : index
    %145 = vector.load %arg5[%c0_91, %c0_92] : memref<4x1xf32, #tpu.memory_space<vmem>>, vector<4x1xf32>
    %146 = vector.broadcast %145 : vector<4x1xf32> to vector<4x64xf32>
    %147 = arith.addf %144, %146 : vector<4x64xf32>
    %cst_93 = arith.constant 0.000000e+00 : f32
    %148 = vector.broadcast %cst_93 : f32 to vector<4x64xf32>
    %149 = arith.maximumf %147, %148 : vector<4x64xf32>
    %150 = vector.broadcast %77 : vector<1x1xf32> to vector<4x64xf32>
    %151 = arith.mulf %150, %149 : vector<4x64xf32>
    %c0_94 = arith.constant 0 : index
    %c3_95 = arith.constant 3 : index
    %c0_96 = arith.constant 0 : index
    %c0_97 = arith.constant 0 : index
    %152 = vector.load %arg7[%c0_94, %c3_95, %c0_96, %c0_97] : memref<1x4x4x64xf32, #tpu.memory_space<vmem>>, vector<1x1x4x64xf32>
    %153 = vector.shape_cast %152 : vector<1x1x4x64xf32> to vector<4x64xf32>
    %154 = arith.addf %151, %153 : vector<4x64xf32>
    %c0_98 = arith.constant 0 : index
    %c3_99 = arith.constant 3 : index
    %c0_100 = arith.constant 0 : index
    %c0_101 = arith.constant 0 : index
    %155 = vector.load %arg8[%c0_98, %c3_99, %c0_100, %c0_101] : memref<1x4x4x64xf32, #tpu.memory_space<vmem>>, vector<1x1x4x64xf32>
    %156 = vector.shape_cast %155 : vector<1x1x4x64xf32> to vector<4x64xf32>
    %157 = vector.shape_cast %154 : vector<4x64xf32> to vector<1x1x4x64xf32>
    tpu.vector_store %arg8[%c0_98, %c3_99, %c0_100, %c0_101], %157 {strides = array<i32>} : memref<1x4x4x64xf32, #tpu.memory_space<vmem>>, vector<1x1x4x64xf32>,
    return
  }
  func.func @transform_0(%arg0: i32) -> (i32, i32, i32, i32) {
    %c0_i32 = arith.constant 0 : i32
    %c0_i32_0 = arith.constant 0 : i32
    %c0_i32_1 = arith.constant 0 : i32
    %c0_i32_2 = arith.constant 0 : i32
    return %arg0, %c0_i32, %c0_i32_0, %c0_i32_1 : i32, i32, i32, i32
  }
  func.func @transform_1(%arg0: i32) -> (i32, i32, i32) {
    %c0_i32 = arith.constant 0 : i32
    %c0_i32_0 = arith.constant 0 : i32
    %c0_i32_1 = arith.constant 0 : i32
    %c0_i32_2 = arith.constant 0 : i32
    return %c0_i32, %c0_i32_0, %c0_i32_1 : i32, i32, i32
  }
  func.func @transform_2(%arg0: i32) -> (i32, i32) {
    %c0_i32 = arith.constant 0 : i32
    %c0_i32_0 = arith.constant 0 : i32
    %c0_i32_1 = arith.constant 0 : i32
    return %c0_i32, %c0_i32_0 : i32, i32
  }
  func.func @transform_3(%arg0: i32) -> (i32, i32) {
    %c0_i32 = arith.constant 0 : i32
    %c0_i32_0 = arith.constant 0 : i32
    %c0_i32_1 = arith.constant 0 : i32
    return %c0_i32, %c0_i32_0 : i32, i32
  }
  func.func @transform_4(%arg0: i32) -> (i32, i32) {
    %c0_i32 = arith.constant 0 : i32
    %c0_i32_0 = arith.constant 0 : i32
    %c0_i32_1 = arith.constant 0 : i32
    return %c0_i32, %c0_i32_0 : i32, i32
  }
  func.func @transform_5(%arg0: i32) -> (i32, i32) {
    %c0_i32 = arith.constant 0 : i32
    %c0_i32_0 = arith.constant 0 : i32
    %c0_i32_1 = arith.constant 0 : i32
    return %c0_i32, %c0_i32_0 : i32, i32
  }
  func.func @transform_6(%arg0: i32) -> (i32, i32, i32, i32) {
    %c0_i32 = arith.constant 0 : i32
    %c0_i32_0 = arith.constant 0 : i32
    %c0_i32_1 = arith.constant 0 : i32
    %c0_i32_2 = arith.constant 0 : i32
    return %arg0, %c0_i32, %c0_i32_0, %c0_i32_1 : i32, i32, i32, i32
  }
  func.func @transform_7(%arg0: i32) -> (i32, i32, i32, i32) {
    %c0_i32 = arith.constant 0 : i32
    %c0_i32_0 = arith.constant 0 : i32
    %c0_i32_1 = arith.constant 0 : i32
    %c0_i32_2 = arith.constant 0 : i32
    return %arg0, %c0_i32, %c0_i32_0, %c0_i32_1 : i32, i32, i32, i32
  }
}

</mosaic_0001>

<bundles_post_ra>
// kernel: attention_forward.3
= control target key start
LH: loop header
LB: loop body
LE: loop exit
PB: predicated region body
PF: predicated region fallthrough
CT: control target
= control target key end

     0   :  { %s817_s27 = smov 0   ;;  %s963_s0 = inlined_call_operand.vmem [shape: f32[2,64,64], index: 0, kind: input, shape index: {}]   ;;  %s964_s1 = inlined_call_operand.vmem [shape: f32[64,32], index: 1, kind: input, shape index: {}]   ;;  %s965_s2 = inlined_call_operand.vmem [shape: f32[1,32], index: 2, kind: input, shape index: {}]   ;;  %s966_s3 = inlined_call_operand.vmem [shape: f32[1,32], index: 3, kind: input, shape index: {}]   ;;  %s967_s4 = inlined_call_operand.vmem [shape: f32[1,32], index: 4, kind: input, shape index: {}]   ;;  %s968_s5 = inlined_call_operand.vmem [shape: f32[32,4], index: 5, kind: input, shape index: {}]   ;;  %s969_s6 = inlined_call_operand.vmem [shape: f32[1,4], index: 6, kind: input, shape index: {}]   ;;  %s970_s7 = inlined_call_operand.vmem [shape: f32[2,64,32], index: 7, kind: output, shape index: {0}]   ;;  %s971_s8 = inlined_call_operand.vmem [shape: f32[2,64,4], index: 8, kind: output, shape index: {1}]  }
   0x1 LB: > { %s702_s28 = sadd.s32 4294967295, %s769_s27   ;;  %p706_p0 = scmp.ge.s32.totalorder %s769_s27, 1  ;;  %s769_s27 = sphi %s817_s27, %s19_s27  }
   0x2   : > { %p265_p1 = scmp.lt.s32.totalorder %s769_s27, 3 }
   0x4   : > { %p266_p2 = pnand %p706_p0, %p265_p1 }
   0x5   : > { %p304_p3 = scmp.lt.s32.totalorder (!%p266_p2), %s702_s28, 1 }
   0x6   : > { %269 = sbr.rel (%p266_p2) target bundleno = 426 (0x1aa), region = 48 }
   0xb   : > { %v334_v0 = vld [vmem:[%s964_s1 + $0x38] sm:$0xff]  ;;  %v333_v1 = vld [vmem:[%s964_s1 + $0x30] sm:$0xff]  ;;  %v332_v2 = vld [vmem:[%s964_s1 + $0x28] sm:$0xff]  ;;  %s973_s28 = smov (!%p304_p3, %s702_s28), 1  ;;  %vm339_vm0 = vcmask 523264   ;;  %vm405_vm1 = vcmask 261120  }
   0xc   : > { %372 = vmatpush.msra.mxu0 %v334_v0  ;;  %734 = vmatpush.msra.mxu2 %v334_v0  ;;  %v331_v3 = vld [vmem:[%s964_s1 + $0x20] sm:$0xff]  ;;  %v330_v4 = vld [vmem:[%s964_s1 + $0x18] sm:$0xff]  ;;  %s840_s17 = sshll.u32 %s973_s28, 6  ;;  %v329_v5 = vld [vmem:[%s964_s1 + $0x10] sm:$0xff]  ;;  %v771_v27 = vmov 64.0   ;;  %vm605_vm6 = vcmask 31744  }
   0xd   : > { %v328_v6 = vld [vmem:[%s964_s1 + $0x8] sm:$0xff]  ;;  %s308_s24 = scalar_lea.vmem %s963_s0, %s840_s17  ;;  %v327_v7 = vld [vmem:[%s964_s1] sm:$0xff]  ;;  %759 = vrcp.f32 %v771_v27  ;;  %s313_s23 = scalar_lea.vmem %s970_s7, %s840_s17 }
   0xe   : > { %373 = vmatpush.msra.mxu0 %v333_v1  ;;  %735 = vmatpush.msra.mxu2 %v333_v1  ;;  %v319_v8 = vld [vmem:[%s308_s24] sm:$0xff]  ;;  %v320_v10 = vld [vmem:[%s308_s24 + $0x8] sm:$0xff]  ;;  %v321_v12 = vld [vmem:[%s308_s24 + $0x10] sm:$0xff]  ;;  %s318_s29 = scalar_lea.vmem %s971_s8, %s840_s17 }
   0xf   : > { %v323_v9 = vld [vmem:[%s308_s24 + $0x20] sm:$0xff]  ;;  %v324_v11 = vld [vmem:[%s308_s24 + $0x28] sm:$0xff]  ;;  %v325_v13 = vld [vmem:[%s308_s24 + $0x30] sm:$0xff] }
  0x10   : > { %374 = vmatpush.msra.mxu0 %v332_v2  ;;  %736 = vmatpush.msra.mxu2 %v332_v2  ;;  %v322_v14 = vld [vmem:[%s308_s24 + $0x18] sm:$0xff]  ;;  %v755_v20 = vld [vmem:[%s965_s2] ss:$0 sm:$0xff] }
  0x11   : > { %v326_v15 = vld [vmem:[%s308_s24 + $0x38] sm:$0xff] }
  0x12   : > { %375 = vmatpush.msra.mxu0 %v331_v3  ;;  %737 = vmatpush.msra.mxu2 %v331_v3 }
  0x13   : > { %v760_v37 = vpop.eup %759 }
  0x14   : > { %376 = vmatpush.msra.mxu0 %v330_v4  ;;  %738 = vmatpush.msra.mxu2 %v330_v4  ;;  %v428_v45 = vmul.f32 64.0, %v760_v37  ;;  %vm432_vm2 = vweird.f32 %v760_v37 }
  0x16   : > { %377 = vmatpush.msra.mxu0 %v329_v5  ;;  %739 = vmatpush.msra.mxu2 %v329_v5  ;;  %v429_v50 = vsub.f32 1.0, %v428_v45 }
  0x18   : > { %378 = vmatpush.msra.mxu0 %v328_v6  ;;  %740 = vmatpush.msra.mxu2 %v328_v6  ;;  %v430_v53 = vmul.f32 %v760_v37, %v429_v50 }
  0x1a   : > { %379 = vmatpush.msra.mxu0 %v327_v7  ;;  %741 = vmatpush.msra.mxu2 %v327_v7  ;;  %v431_v56 = vadd.f32 %v760_v37, %v430_v53 }
  0x1b   : > { %713 = vmatmul.msk.f32.vlgmr.msra.gmra.mxu0 %vm339_vm0, %v319_v8  ;;  %717 = vmatmul.msk.f32.vlgmr.msra.gmra.mxu2 %vm339_vm0, %v323_v9 }
  0x1c   : > { %v433_v59 = vsel %vm432_vm2, %v760_v37, %v431_v56 }
  0x23   : > { %714 = vmatmul.msk.f32.gmra.mxu0 %vm339_vm0, %v320_v10  ;;  %718 = vmatmul.msk.f32.gmra.mxu2 %vm339_vm0, %v324_v11 }
  0x2b   : > { %715 = vmatmul.msk.f32.gmra.mxu0 %vm339_vm0, %v321_v12  ;;  %719 = vmatmul.msk.f32.gmra.mxu2 %vm339_vm0, %v325_v13 }
  0x33   : > { %716 = vmatmul.msk.f32.gmra.mxu0 %vm339_vm0, %v322_v14  ;;  %720 = vmatmul.msk.f32.gmra.mxu2 %vm339_vm0, %v326_v15 }
  0x98   : > { %v381_v16 = vpop.f32.mrf.mxu0 }
  0x99   : > { %v382_v23 = vadd.f32 %v755_v20, %v381_v16 }
  0x9b   : > { %v406_v28 = vsel %vm405_vm1, %v382_v23, 0.0 }
  0x9e   : > { %v393_v17 = vpop.f32.mrf.mxu2 }
  0x9f   : > { %v394_v32 = vadd.f32 %v755_v20, %v393_v17 }
  0xa0   : > { %v384_v18 = vpop.f32.mrf.mxu0 }
  0xa1   : > { %v385_v22 = vadd.f32 %v755_v20, %v384_v18  ;;  %v413_v39 = vsel %vm405_vm1, %v394_v32, 0.0 }
  0xa3   : > { %v407_v25 = vsel %vm405_vm1, %v385_v22, 0.0 }
  0xa4   : > { %v408_v30 = vadd.f32 %v407_v25, %v406_v28 }
  0xa6   : > { %v396_v19 = vpop.f32.mrf.mxu2 }
  0xa7   : > { %v397_v35 = vadd.f32 %v755_v20, %v396_v19 }
  0xa8   : > { %v387_v21 = vpop.f32.mrf.mxu0 }
  0xa9   : > { %v388_v24 = vadd.f32 %v755_v20, %v387_v21  ;;  %v415_v43 = vsel %vm405_vm1, %v397_v35, 0.0 }
  0xab   : > { %v409_v29 = vsel %vm405_vm1, %v388_v24, 0.0 }
  0xac   : > { %v410_v34 = vadd.f32 %v409_v29, %v408_v30 }
  0xae   : > { %v399_v26 = vpop.f32.mrf.mxu2 }
  0xaf   : > { %v400_v40 = vadd.f32 %v755_v20, %v399_v26 }
  0xb0   : > { %v390_v31 = vpop.f32.mrf.mxu0 }
  0xb1   : > { %v391_v33 = vadd.f32 %v755_v20, %v390_v31  ;;  %v417_v47 = vsel %vm405_vm1, %v400_v40, 0.0  ;;  %v535_v31 = vld [vmem:[%s968_s5 + $0x18] sm:$0xff] }
  0xb2   : > { %576 = vmatpush.msra.mxu1 %v535_v31  ;;  %742 = vmatpush.msra.mxu3 %v535_v31 }
  0xb3   : > { %v411_v36 = vsel %vm405_vm1, %v391_v33, 0.0 }
  0xb4   : > { %v412_v38 = vadd.f32 %v411_v36, %v410_v34  ;;  %v533_v34 = vld [vmem:[%s968_s5 + $0x8] sm:$0xff]  ;;  %v532_v36 = vld [vmem:[%s968_s5] sm:$0xff] }
  0xb6   : > { %v414_v41 = vadd.f32 %v413_v39, %v412_v38  ;;  %v402_v42 = vpop.f32.mrf.mxu2 }
  0xb7   : > { %v403_v44 = vadd.f32 %v755_v20, %v402_v42 }
  0xb8   : > { %v416_v46 = vadd.f32 %v415_v43, %v414_v41 }
  0xb9   : > { %v419_v48 = vsel %vm405_vm1, %v403_v44, 0.0 }
  0xba   : > { %v418_v49 = vadd.f32 %v417_v47, %v416_v46  ;;  %v756_v47 = vld [vmem:[%s966_s3] ss:$0 sm:$0xff] }
  0xbc   : > { %v420_v51 = vadd.f32 %v419_v48, %v418_v49 }
  0xbe   : > { %v421_v52 = vrot.slane %v420_v51, 4 }
  0xc0   : > { %v422_v54 = vadd.f32 %v421_v52, %v420_v51  ;;  %v757_v51 = vld [vmem:[%s967_s4] ss:$0 sm:$0xff] }
  0xc2   : > { %v423_v55 = vrot.slane %v422_v54, 2 }
  0xc4   : > { %v424_v57 = vadd.f32 %v423_v55, %v422_v54 }
  0xc6   : > { %v425_v58 = vrot.slane %v424_v57, 1 }
  0xc8   : > { %v426_v60 = vadd.f32 %v425_v58, %v424_v57 }
  0xca   : > { %v434_v61 = vmul.f32 %v433_v59, %v426_v60 }
  0xcc   : > { %v874_v62 = vsub.f32 %v382_v23, %v434_v61  ;;  %v876_v63 = vsub.f32 %v385_v22, %v434_v61  ;;  %v878_v0 = vsub.f32 %v388_v24, %v434_v61  ;;  %v880_v1 = vsub.f32 %v391_v33, %v434_v61 }
  0xcd   : > { %v882_v2 = vsub.f32 %v394_v32, %v434_v61  ;;  %v440_v6 = vsub.f32 %v397_v35, %v434_v61  ;;  %v441_v11 = vsub.f32 %v400_v40, %v434_v61  ;;  %v442_v15 = vsub.f32 %v403_v44, %v434_v61  ;;  %v534_v32 = vld [vmem:[%s968_s5 + $0x10] sm:$0xff] }
  0xce   : > { %v443_v3 = vmul.f32 %v874_v62, %v874_v62  ;;  %v444_v4 = vmul.f32 %v876_v63, %v876_v63  ;;  %v445_v5 = vmul.f32 %v878_v0, %v878_v0  ;;  %v446_v7 = vmul.f32 %v880_v1, %v880_v1  ;;  %577 = vmatpush.msra.mxu1 %v534_v32 }
  0xcf   : > { %v447_v12 = vmul.f32 %v882_v2, %v882_v2  ;;  %v448_v16 = vmul.f32 %v440_v6, %v440_v6  ;;  %v449_v19 = vmul.f32 %v441_v11, %v441_v11  ;;  %v450_v22 = vmul.f32 %v442_v15, %v442_v15  ;;  %743 = vmatpush.msra.mxu3 %v534_v32 }
  0xd0   : > { %v451_v8 = vsel %vm405_vm1, %v443_v3, 0.0  ;;  %v452_v9 = vsel %vm405_vm1, %v444_v4, 0.0  ;;  %v454_v13 = vsel %vm405_vm1, %v445_v5, 0.0  ;;  %v456_v17 = vsel %vm405_vm1, %v446_v7, 0.0  ;;  %578 = vmatpush.msra.mxu1 %v533_v34 }
  0xd1   : > { %v453_v10 = vadd.f32 %v452_v9, %v451_v8  ;;  %v458_v20 = vsel %vm405_vm1, %v447_v12, 0.0  ;;  %v460_v23 = vsel %vm405_vm1, %v448_v16, 0.0  ;;  %v462_v25 = vsel %vm405_vm1, %v449_v19, 0.0  ;;  %744 = vmatpush.msra.mxu3 %v533_v34 }
  0xd2   : > { %v464_v27 = vsel %vm405_vm1, %v450_v22, 0.0  ;;  %579 = vmatpush.msra.mxu1 %v532_v36 }
  0xd3   : > { %v455_v14 = vadd.f32 %v454_v13, %v453_v10  ;;  %745 = vmatpush.msra.mxu3 %v532_v36 }
  0xd5   : > { %v457_v18 = vadd.f32 %v456_v17, %v455_v14 }
  0xd7   : > { %v459_v21 = vadd.f32 %v458_v20, %v457_v18  ;;  %v758_v18 = vld [vmem:[%s969_s6] ss:$0 sm:$0xff] }
  0xd9   : > { %v461_v24 = vadd.f32 %v460_v23, %v459_v21 }
  0xdb   : > { %v463_v26 = vadd.f32 %v462_v25, %v461_v24 }
  0xdd   : > { %v465_v28 = vadd.f32 %v464_v27, %v463_v26 }
  0xdf   : > { %v466_v29 = vrot.slane %v465_v28, 4 }
  0xe1   : > { %v467_v30 = vadd.f32 %v466_v29, %v465_v28 }
  0xe3   : > { %v468_v33 = vrot.slane %v467_v30, 2 }
  0xe5   : > { %v469_v35 = vadd.f32 %v468_v33, %v467_v30 }
  0xe7   : > { %v470_v37 = vrot.slane %v469_v35, 1 }
  0xe9   : > { %v471_v38 = vadd.f32 %v470_v37, %v469_v35 }
  0xeb   : > { %v472_v39 = vmul.f32 %v471_v38, %v433_v59 }
  0xed   : > { %v473_v40 = vadd.f32 1e-05, %v472_v39 }
  0xef   : > { %761 = vrsqrt.f32 %v473_v40  ;;  %vm480_vm4 = vweird.f32 %v473_v40 }
  0xf5   : > { %v762_v41 = vpop.eup %761 }
  0xf6   : > { %v475_v42 = vmul.f32 %v762_v41, %v473_v40  ;;  %vm481_vm3 = vweird.f32 %v762_v41 }
  0xf7   : > { %vm482_vm5 = vmor %vm480_vm4, %vm481_vm3 }
  0xf8   : > { %v476_v43 = vmul.f32 %v762_v41, %v475_v42 }
  0xfa   : > { %v477_v44 = vmul.f32 0.5, %v476_v43 }
  0xfc   : > { %v478_v45 = vsub.f32 1.5, %v477_v44 }
  0xfe   : > { %v479_v46 = vmul.f32 %v762_v41, %v478_v45 }
 0x100   : > { %v483_v48 = vsel %vm482_vm5, %v762_v41, %v479_v46 }
 0x101   : > { %v491_v49 = vmul.f32 %v483_v48, %v442_v15  ;;  %v484_v50 = vmul.f32 %v483_v48, %v874_v62  ;;  %v489_v52 = vmul.f32 %v483_v48, %v440_v6  ;;  %v485_v53 = vmul.f32 %v483_v48, %v876_v63 }
 0x102   : > { %v490_v54 = vmul.f32 %v483_v48, %v441_v11  ;;  %v486_v55 = vmul.f32 %v483_v48, %v878_v0  ;;  %v487_v56 = vmul.f32 %v483_v48, %v880_v1  ;;  %v488_v57 = vmul.f32 %v483_v48, %v882_v2 }
 0x103   : > { %v496_v58 = vmul.f32 %v756_v47, %v484_v50  ;;  %v501_v59 = vmul.f32 %v756_v47, %v489_v52  ;;  %v497_v60 = vmul.f32 %v756_v47, %v485_v53  ;;  %v503_v61 = vmul.f32 %v756_v47, %v491_v49 }
 0x104   : > { %v502_v62 = vmul.f32 %v756_v47, %v490_v54  ;;  %v498_v3 = vmul.f32 %v756_v47, %v486_v55  ;;  %v499_v4 = vmul.f32 %v756_v47, %v487_v56  ;;  %v500_v5 = vmul.f32 %v756_v47, %v488_v57 }
 0x105   : > { %v508_v7 = vadd.f32 %v757_v51, %v496_v58  ;;  %v513_v6 = vadd.f32 %v757_v51, %v501_v59  ;;  %v509_v8 = vadd.f32 %v757_v51, %v497_v60  ;;  %v515_v1 = vadd.f32 %v757_v51, %v503_v61 }
 0x106   : > { %v514_v63 = vadd.f32 %v757_v51, %v502_v62  ;;  %v510_v0 = vadd.f32 %v757_v51, %v498_v3  ;;  %v511_v11 = vadd.f32 %v757_v51, %v499_v4  ;;  %v512_v13 = vadd.f32 %v757_v51, %v500_v5 }
 0x107   : > { %v516_v9 = vmax.f32 %v508_v7, 0.0  ;;  %v521_v2 = vmax.f32 %v513_v6, 0.0  ;;  %v517_v10 = vmax.f32 %v509_v8, 0.0  ;;  %v523_v15 = vmax.f32 %v515_v1, 0.0 }
 0x108   : > { %v522_v12 = vmax.f32 %v514_v63, 0.0  ;;  %v518_v14 = vmax.f32 %v510_v0, 0.0  ;;  %v519_v16 = vmax.f32 %v511_v11, 0.0  ;;  %v520_v17 = vmax.f32 %v512_v13, 0.0 }
 0x109   : > { %524 = vst.msk [vmem:[%s313_s23] sm:$0xff] %vm405_vm1, %v516_v9  ;;  %721 = vmatmul.msk.f32.vlgmr.msra.gmra.mxu1 %vm405_vm1, %v516_v9  ;;  %726 = vmatmul.msk.f32.vlgmr.msra.gmra.mxu3 %vm405_vm1, %v521_v2 }
 0x10a   : > { %529 = vst.msk [vmem:[%s313_s23 + $0x28] sm:$0xff] %vm405_vm1, %v521_v2 }
 0x10b   : > { %525 = vst.msk [vmem:[%s313_s23 + $0x8] sm:$0xff] %vm405_vm1, %v517_v10 }
 0x10c   : > { %530 = vst.msk [vmem:[%s313_s23 + $0x30] sm:$0xff] %vm405_vm1, %v522_v12 }
 0x10d   : > { %526 = vst.msk [vmem:[%s313_s23 + $0x10] sm:$0xff] %vm405_vm1, %v518_v14 }
 0x10e   : > { %531 = vst.msk [vmem:[%s313_s23 + $0x38] sm:$0xff] %vm405_vm1, %v523_v15 }
 0x10f   : > { %527 = vst.msk [vmem:[%s313_s23 + $0x18] sm:$0xff] %vm405_vm1, %v519_v16 }
 0x110   : > { %528 = vst.msk [vmem:[%s313_s23 + $0x20] sm:$0xff] %vm405_vm1, %v520_v17 }
 0x111   : > { %722 = vmatmul.msk.f32.gmra.mxu1 %vm405_vm1, %v517_v10  ;;  %727 = vmatmul.msk.f32.gmra.mxu3 %vm405_vm1, %v522_v12 }
 0x119   : > { %723 = vmatmul.msk.f32.gmra.mxu1 %vm405_vm1, %v518_v14  ;;  %728 = vmatmul.msk.f32.gmra.mxu3 %vm405_vm1, %v523_v15 }
 0x121   : > { %724 = vmatmul.msk.f32.gmra.mxu1 %vm405_vm1, %v519_v16 }
 0x129   : > { %725 = vmatmul.msk.f32.gmra.mxu1 %vm405_vm1, %v520_v17 }
 0x186   : > { %v581_v19 = vpop.f32.mrf.mxu1 }
 0x187   : > { %v582_v20 = vadd.f32 %v758_v18, %v581_v19 }
 0x189   : > { %606 = vst.msk [vmem:[%s318_s29] sm:$0xff] %vm605_vm6, %v582_v20 }
 0x18c   : > { %v596_v21 = vpop.f32.mrf.mxu3 }
 0x18d   : > { %v597_v22 = vadd.f32 %v758_v18, %v596_v21 }
 0x18e   : > { %v584_v23 = vpop.f32.mrf.mxu1 }
 0x18f   : > { %611 = vst.msk [vmem:[%s318_s29 + $0x28] sm:$0xff] %vm605_vm6, %v597_v22  ;;  %v585_v24 = vadd.f32 %v758_v18, %v584_v23 }
 0x191   : > { %607 = vst.msk [vmem:[%s318_s29 + $0x8] sm:$0xff] %vm605_vm6, %v585_v24 }
 0x194   : > { %v599_v25 = vpop.f32.mrf.mxu3 }
 0x195   : > { %v600_v26 = vadd.f32 %v758_v18, %v599_v25 }
 0x196   : > { %v587_v27 = vpop.f32.mrf.mxu1 }
 0x197   : > { %612 = vst.msk [vmem:[%s318_s29 + $0x30] sm:$0xff] %vm605_vm6, %v600_v26  ;;  %v588_v28 = vadd.f32 %v758_v18, %v587_v27 }
 0x199   : > { %608 = vst.msk [vmem:[%s318_s29 + $0x10] sm:$0xff] %vm605_vm6, %v588_v28 }
 0x19c   : > { %v602_v29 = vpop.f32.mrf.mxu3 }
 0x19d   : > { %v603_v30 = vadd.f32 %v758_v18, %v602_v29 }
 0x19e   : > { %v590_v31 = vpop.f32.mrf.mxu1 }
 0x19f   : > { %613 = vst.msk [vmem:[%s318_s29 + $0x38] sm:$0xff] %vm605_vm6, %v603_v30  ;;  %v591_v32 = vadd.f32 %v758_v18, %v590_v31 }
 0x1a1   : > { %609 = vst.msk [vmem:[%s318_s29 + $0x18] sm:$0xff] %vm605_vm6, %v591_v32 }
 0x1a6   : > { %v593_v33 = vpop.f32.mrf.mxu1 }
 0x1a7   : > { %v594_v34 = vadd.f32 %v758_v18, %v593_v33 }
 0x1a9   : > { %610 = vst.msk [vmem:[%s318_s29 + $0x20] sm:$0xff] %vm605_vm6, %v594_v34 }
 0x1aa PF: > { %s19_s27 = sadd.s32 1, %s769_s27  }
 0x1ab   : > { %p16_p4 = scmp.ge.s32.totalorder %s19_s27, 4  }
 0x1ad   :  { %18 = sbr.rel (!%p16_p4) target bundleno = 1 (0x1), region = 90 }

// kernel: attention_forward.4
= control target key start
LH: loop header
LB: loop body
LE: loop exit
PB: predicated region body
PF: predicated region fallthrough
CT: control target
= control target key end

     0   :  { %s779_s18 = smov 0   ;;  %s885_s0 = inlined_call_operand.vmem [shape: f32[2,64,32], index: 0, kind: input, shape index: {}]   ;;  %s886_s1 = inlined_call_operand.vmem [shape: f32[2,2,16], index: 1, kind: input, shape index: {}]   ;;  %s887_s2 = inlined_call_operand.vmem [shape: f32[2,16,2], index: 2, kind: input, shape index: {}]   ;;  %s888_s3 = inlined_call_operand.vmem [shape: f32[32,2], index: 3, kind: input, shape index: {}]   ;;  %s889_s4 = inlined_call_operand.vmem [shape: f32[1,2], index: 4, kind: input, shape index: {}]   ;;  %s890_s5 = inlined_call_operand.vmem [shape: f32[2,64,2], index: 5, kind: output, shape index: {}]  }
   0x1 LB: > { %s655_s19 = sadd.s32 4294967295, %s747_s18   ;;  %p659_p0 = scmp.ge.s32.totalorder %s747_s18, 1  ;;  %s747_s18 = sphi %s779_s18, %s15_s18  }
   0x2   : > { %p206_p1 = scmp.lt.s32.totalorder %s747_s18, 3 }
   0x4   : > { %p207_p2 = pnand %p659_p0, %p206_p1 }
   0x5   : > { %p243_p3 = scmp.lt.s32.totalorder (!%p207_p2), %s655_s19, 1 }
   0x6   : > { %210 = sbr.rel (%p207_p2) target bundleno = 620 (0x26c), region = 40 }
   0xb   : > { %s892_s19 = smov (!%p243_p3, %s655_s19), 1  ;;  %vm280_vm0 = vcmask 1041408   ;;  %v263_v0 = vld [vmem:[%s888_s3] sm:$0xff]  ;;  %vm267_vm1 = vcmask 15360   ;;  %v264_v2 = vld [vmem:[%s888_s3 + $0x8] sm:$0xff]  ;;  %v265_v3 = vld [vmem:[%s888_s3 + $0x10] sm:$0xff] }
   0xc   : > { %s662_s20 = sshll.u32 %s892_s19, 1  ;;  %v266_v4 = vld [vmem:[%s888_s3 + $0x18] sm:$0xff]  ;;  %v313_v5 = vld [vmem:[%s889_s4] sm:$0x1]  ;;  %s692_s9 = sshll.u32 %s892_s19, 6  ;;  %vm346_vm2 = vcmask 261120  }
   0xd   : > { %s251_s23 = scalar_lea.vmem %s886_s1, %s662_s20  ;;  %s247_s12 = scalar_lea.vmem %s885_s0, %s692_s9  ;;  %vm412_vm3 = vcmask 130048  }
   0xe   : > { %v262_v1 = vld [vmem:[%s251_s23] sm:$0x3]  ;;  %v340_v11 = vld [vmem:[%s247_s12 + $0x18] sm:$0xff]  ;;  %v338_v12 = vld [vmem:[%s247_s12 + $0x8] sm:$0xff]  ;;  %s693_s13 = sshll.u32 %s892_s19, 4  ;;  %s864_s21 = scalar_lea.vmem %s890_s5, %s692_s9 }
   0xf   : > { %667 = vmatpush.msk.msra.mxu0 %vm280_vm0, %v262_v1  ;;  %672 = vmatpush.msk.msra.mxu1 %vm280_vm0, %v262_v1  ;;  %v337_v10 = vld [vmem:[%s247_s12] sm:$0xff]  ;;  %v339_v14 = vld [vmem:[%s247_s12 + $0x10] sm:$0xff]  ;;  %v342_v15 = vld [vmem:[%s247_s12 + $0x28] sm:$0xff]  ;;  %s256_s16 = scalar_lea.vmem %s887_s2, %s693_s13 }
  0x10   : > { %668 = vmatmul.msk.f32.vlgmr.msra.gmra.mxu0 %vm267_vm1, %v263_v0  ;;  %673 = vmatmul.msk.f32.vlgmr.msra.gmra.mxu1 %vm267_vm1, %v313_v5  ;;  %v341_v13 = vld [vmem:[%s247_s12 + $0x20] sm:$0xff]  ;;  %v343_v16 = vld [vmem:[%s247_s12 + $0x30] sm:$0xff]  ;;  %v344_v17 = vld [vmem:[%s247_s12 + $0x38] sm:$0xff] }
  0x11   : > { %v486_v44 = vld [vmem:[%s256_s16 + $0x8] sm:$0xff]  ;;  %v485_v45 = vld [vmem:[%s256_s16] sm:$0xff] }
  0x12   : > { %699 = vmatpush.msra.mxu3 %v486_v44  ;;  %525 = vmatpush.msrb.mxu0 %v486_v44 }
  0x14   : > { %700 = vmatpush.msra.mxu3 %v485_v45  ;;  %526 = vmatpush.msrb.mxu0 %v485_v45 }
  0x18   : > { %669 = vmatmul.msk.f32.gmra.mxu0 %vm267_vm1, %v264_v2 }
  0x20   : > { %670 = vmatmul.msk.f32.gmra.mxu0 %vm267_vm1, %v265_v3 }
  0x28   : > { %671 = vmatmul.msk.f32.gmra.mxu0 %vm267_vm1, %v266_v4 }
  0x8d   : > { %v301_v6 = vpop.f32.mrf.mxu0  ;;  %v334_v18 = vpop.f32.mrf.mxu1 }
  0x8e   : > { %v345_v22 = vperm.slane %v334_v18, 0 }
  0x95   : > { %v304_v7 = vpop.f32.mrf.mxu0 }
  0x9d   : > { %v307_v8 = vpop.f32.mrf.mxu0 }
  0xa5   : > { %v310_v9 = vpop.f32.mrf.mxu0 }
  0xa6   : > { %383 = vmatpush.msrb.mxu1 %v310_v9  ;;  %695 = vmatpush.msra.mxu2 %v310_v9 }
  0xa8   : > { %384 = vmatpush.msrb.mxu1 %v307_v8  ;;  %696 = vmatpush.msra.mxu2 %v307_v8 }
  0xaa   : > { %385 = vmatpush.msrb.mxu1 %v304_v7  ;;  %697 = vmatpush.msra.mxu2 %v304_v7 }
  0xac   : > { %386 = vmatpush.msrb.mxu1 %v301_v6  ;;  %698 = vmatpush.msra.mxu2 %v301_v6 }
  0xad   : > { %674 = vmatmul.msk.f32.vlgmr.msrb.gmra.mxu1 %vm346_vm2, %v337_v10  ;;  %677 = vmatmul.msk.f32.vlgmr.msra.gmra.mxu2 %vm346_vm2, %v340_v11 }
  0xb5   : > { %675 = vmatmul.msk.f32.gmra.mxu1 %vm346_vm2, %v338_v12  ;;  %678 = vmatmul.msk.f32.gmra.mxu2 %vm346_vm2, %v341_v13 }
  0xbd   : > { %676 = vmatmul.msk.f32.gmra.mxu1 %vm346_vm2, %v339_v14  ;;  %679 = vmatmul.msk.f32.gmra.mxu2 %vm346_vm2, %v342_v15 }
  0xc5   : > { %680 = vmatmul.msk.f32.gmra.mxu2 %vm346_vm2, %v343_v16 }
  0xcd   : > { %681 = vmatmul.msk.f32.gmra.mxu2 %vm346_vm2, %v344_v17 }
 0x12a   : > { %v388_v19 = vpop.f32.mrf.mxu1 }
 0x12b   : > { %v389_v39 = vadd.f32 %v388_v19, %v345_v22 }
 0x12d   : > { %v413_v43 = vsel %vm412_vm3, %v389_v39, -inf }
 0x130   : > { %v397_v20 = vpop.f32.mrf.mxu2 }
 0x131   : > { %v398_v30 = vadd.f32 %v397_v20, %v345_v22 }
 0x132   : > { %v391_v21 = vpop.f32.mrf.mxu1 }
 0x133   : > { %v422_v33 = vsel %vm412_vm3, %v398_v30, -inf  ;;  %v392_v34 = vadd.f32 %v391_v21, %v345_v22 }
 0x135   : > { %v416_v38 = vsel %vm412_vm3, %v392_v34, -inf }
 0x138   : > { %v400_v23 = vpop.f32.mrf.mxu2 }
 0x139   : > { %v401_v24 = vadd.f32 %v400_v23, %v345_v22 }
 0x13a   : > { %v394_v25 = vpop.f32.mrf.mxu1 }
 0x13b   : > { %v395_v26 = vadd.f32 %v394_v25, %v345_v22  ;;  %v425_v27 = vsel %vm412_vm3, %v401_v24, -inf }
 0x13c   : > { %426 = vmax.xlane.f32.xlu1 %v425_v27 }
 0x13d   : > { %v419_v28 = vsel %vm412_vm3, %v395_v26, -inf }
 0x13e   : > { %420 = vmax.xlane.f32.xlu0 %v419_v28 }
 0x140   : > { %v403_v29 = vpop.f32.mrf.mxu2 }
 0x141   : > { %v404_v31 = vadd.f32 %v403_v29, %v345_v22 }
 0x143   : > { %v428_v32 = vsel %vm412_vm3, %v404_v31, -inf }
 0x144   : > { %429 = vmax.xlane.f32.xlu1 %v428_v32 }
 0x146   : > { %423 = vmax.xlane.f32.xlu0 %v422_v33 }
 0x148   : > { %v406_v35 = vpop.f32.mrf.mxu2 }
 0x149   : > { %v831_v36 = vadd.f32 %v406_v35, %v345_v22 }
 0x14b   : > { %v431_v37 = vsel %vm412_vm3, %v831_v36, -inf }
 0x14c   : > { %432 = vmax.xlane.f32.xlu2 %v431_v37  ;;  %417 = vmax.xlane.f32.xlu1 %v416_v38 }
 0x150   : > { %v409_v40 = vpop.f32.mrf.mxu2 }
 0x151   : > { %v410_v41 = vadd.f32 %v409_v40, %v345_v22 }
 0x153   : > { %v434_v42 = vsel %vm412_vm3, %v410_v41, -inf }
 0x154   : > { %435 = vmax.xlane.f32.xlu0 %v434_v42  ;;  %414 = vmax.xlane.f32.xlu2 %v413_v43 }
 0x1af   : > { %v427_v46 = vpop.xlane.xlu1 %426 }
 0x1b0   : > { %v441_v58 = vsub.f32 %v401_v24, %v427_v46 }
 0x1b1   : > { %v421_v47 = vpop.xlane.xlu0 %420 }
 0x1b2   : > { %v439_v48 = vsub.f32 %v395_v26, %v421_v47  ;;  %v453_v63 = vmul.f32 1.442695, %v441_v58 }
 0x1b4   : > { %v449_v49 = vmul.f32 1.442695, %v439_v48 }
 0x1b6   : > { %709 = vpow2.f32 %v449_v49 }
 0x1b7   : > { %v430_v50 = vpop.xlane.xlu1 %429 }
 0x1b8   : > { %v442_v51 = vsub.f32 %v404_v31, %v430_v50 }
 0x1b9   : > { %v424_v52 = vpop.xlane.xlu0 %423 }
 0x1ba   : > { %v455_v53 = vmul.f32 1.442695, %v442_v51  ;;  %v440_v54 = vsub.f32 %v398_v30, %v424_v52 }
 0x1bc   : > { %v710_v55 = vpop.eup %709  ;;  %711 = vpow2.f32 %v455_v53  ;;  %v451_v56 = vmul.f32 1.442695, %v440_v54 }
 0x1bd   : > { %684 = vmatmul.msk.f32.vlgmr.msra.gmra.mxu3 %vm412_vm3, %v710_v55  ;;  %v467_v57 = vsel %vm412_vm3, %v710_v55, 0.0 }
 0x1be   : > { %713 = vpow2.f32 %v451_v56  ;;  %468 = vadd.xlane.f32.xlu1 %v467_v57 }
 0x1bf   : > { %v433_v59 = vpop.xlane.xlu2 %432  ;;  %v418_v60 = vpop.xlane.xlu1 %417 }
 0x1c0   : > { %v438_v61 = vsub.f32 %v392_v34, %v418_v60  ;;  %v443_v11 = vsub.f32 %v831_v36, %v433_v59 }
 0x1c2   : > { %v712_v62 = vpop.eup %711  ;;  %v447_v0 = vmul.f32 1.442695, %v438_v61  ;;  %v457_v14 = vmul.f32 1.442695, %v443_v11 }
 0x1c3   : > { %v476_v2 = vsel %vm412_vm3, %v712_v62, 0.0 }
 0x1c4   : > { %v714_v1 = vpop.eup %713  ;;  %715 = vpow2.f32 %v447_v0 }
 0x1c5   : > { %685 = vmatmul.msk.f32.gmra.mxu3 %vm412_vm3, %v714_v1  ;;  %717 = vpow2.f32 %v453_v63  ;;  %v470_v19 = vsel %vm412_vm3, %v714_v1, 0.0 }
 0x1c6   : > { %477 = vadd.xlane.f32.xlu1 %v476_v2 }
 0x1c7   : > { %v415_v3 = vpop.xlane.xlu2 %414  ;;  %v436_v4 = vpop.xlane.xlu0 %435 }
 0x1c8   : > { %v437_v5 = vsub.f32 %v389_v39, %v415_v3  ;;  %v444_v8 = vsub.f32 %v410_v41, %v436_v4 }
 0x1ca   : > { %v445_v6 = vmul.f32 1.442695, %v437_v5  ;;  %v716_v7 = vpop.eup %715  ;;  %v459_v12 = vmul.f32 1.442695, %v444_v8 }
 0x1cb   : > { %v718_v9 = vpop.eup %717  ;;  %v464_v10 = vsel %vm412_vm3, %v716_v7, 0.0 }
 0x1cc   : > { %719 = vpow2.f32 %v445_v6  ;;  %465 = vadd.xlane.f32.xlu0 %v464_v10  ;;  %v473_v15 = vsel %vm412_vm3, %v718_v9, 0.0 }
 0x1cd   : > { %686 = vmatmul.msk.f32.gmra.mxu3 %vm412_vm3, %v718_v9  ;;  %721 = vpow2.f32 %v459_v12 }
 0x1ce   : > { %723 = vpow2.f32 %v457_v14 }
 0x1d2   : > { %v720_v13 = vpop.eup %719 }
 0x1d3   : > { %682 = vmatmul.msk.f32.vlgmr.msrb.gmra.mxu0 %vm412_vm3, %v720_v13  ;;  %v461_v16 = vsel %vm412_vm3, %v720_v13, 0.0  ;;  %v722_v17 = vpop.eup %721 }
 0x1d4   : > { %474 = vadd.xlane.f32.xlu0 %v473_v15  ;;  %462 = vadd.xlane.f32.xlu2 %v461_v16  ;;  %v482_v18 = vsel %vm412_vm3, %v722_v17, 0.0  ;;  %v724_v20 = vpop.eup %723 }
 0x1d5   : > { %687 = vmatmul.msk.f32.gmra.mxu3 %vm412_vm3, %v712_v62  ;;  %v479_v21 = vsel %vm412_vm3, %v724_v20, 0.0 }
 0x1db   : > { %683 = vmatmul.msk.f32.gmra.mxu0 %vm412_vm3, %v716_v7 }
 0x1dc   : > { %483 = vadd.xlane.f32.xlu0 %v482_v18  ;;  %471 = vadd.xlane.f32.xlu2 %v470_v19 }
 0x1dd   : > { %688 = vmatmul.msk.f32.gmra.mxu3 %vm412_vm3, %v724_v20 }
 0x1e4   : > { %480 = vadd.xlane.f32.xlu2 %v479_v21 }
 0x1e5   : > { %689 = vmatmul.msk.f32.gmra.mxu3 %vm412_vm3, %v722_v17 }
 0x231   : > { %v469_v22 = vpop.xlane.xlu1 %468 }
 0x232   : > { %725 = vrcp.f32 %v469_v22 }
 0x238   : > { %v726_v23 = vpop.eup %725 }
 0x239   : > { %v478_v30 = vpop.xlane.xlu1 %477 }
 0x23f   : > { %v466_v24 = vpop.xlane.xlu0 %465 }
 0x240   : > { %v534_v25 = vpop.f32.mrf.mxu3 }
 0x241   : > { %v562_v26 = vmul.f32 %v726_v23, %v534_v25 }
 0x243   : > { %570 = vst.msk [vmem:[%s864_s21 + $0x10] sm:$0xff] %vm267_vm1, %v562_v26 }
 0x247   : > { %v475_v27 = vpop.xlane.xlu0 %474  ;;  %v463_v28 = vpop.xlane.xlu2 %462 }
 0x248   : > { %v537_v29 = vpop.f32.mrf.mxu3  ;;  %727 = vrcp.f32 %v475_v27 }
 0x249   : > { %729 = vrcp.f32 %v463_v28 }
 0x24a   : > { %731 = vrcp.f32 %v478_v30 }
 0x24e   : > { %v728_v31 = vpop.eup %727 }
 0x24f   : > { %v472_v32 = vpop.xlane.xlu2 %471  ;;  %v730_v33 = vpop.eup %729 }
 0x250   : > { %v528_v34 = vpop.f32.mrf.mxu0  ;;  %v540_v35 = vpop.f32.mrf.mxu3  ;;  %733 = vrcp.f32 %v472_v32 }
 0x251   : > { %v560_v36 = vmul.f32 %v730_v33, %v528_v34  ;;  %v564_v37 = vmul.f32 %v728_v31, %v540_v35  ;;  %735 = vrcp.f32 %v466_v24  ;;  %v732_v38 = vpop.eup %731  ;;  %v484_v47 = vpop.xlane.xlu0 %483 }
 0x253   : > { %568 = vst.msk [vmem:[%s864_s21] sm:$0xff] %vm267_vm1, %v560_v36 }
 0x254   : > { %572 = vst.msk [vmem:[%s864_s21 + $0x20] sm:$0xff] %vm267_vm1, %v564_v37 }
 0x256   : > { %v734_v39 = vpop.eup %733 }
 0x257   : > { %v481_v40 = vpop.xlane.xlu2 %480  ;;  %v736_v41 = vpop.eup %735  ;;  %v563_v42 = vmul.f32 %v734_v39, %v537_v29 }
 0x258   : > { %v531_v43 = vpop.f32.mrf.mxu0  ;;  %v543_v44 = vpop.f32.mrf.mxu3  ;;  %737 = vrcp.f32 %v481_v40 }
 0x259   : > { %v561_v45 = vmul.f32 %v736_v41, %v531_v43  ;;  %v565_v46 = vmul.f32 %v732_v38, %v543_v44  ;;  %571 = vst.msk [vmem:[%s864_s21 + $0x18] sm:$0xff] %vm267_vm1, %v563_v42  ;;  %739 = vrcp.f32 %v484_v47 }
 0x25b   : > { %569 = vst.msk [vmem:[%s864_s21 + $0x8] sm:$0xff] %vm267_vm1, %v561_v45 }
 0x25c   : > { %573 = vst.msk [vmem:[%s864_s21 + $0x28] sm:$0xff] %vm267_vm1, %v565_v46 }
 0x25e   : > { %v738_v48 = vpop.eup %737 }
 0x25f   : > { %v740_v51 = vpop.eup %739 }
 0x260   : > { %v546_v49 = vpop.f32.mrf.mxu3 }
 0x261   : > { %v566_v50 = vmul.f32 %v738_v48, %v546_v49 }
 0x263   : > { %574 = vst.msk [vmem:[%s864_s21 + $0x30] sm:$0xff] %vm267_vm1, %v566_v50 }
 0x268   : > { %v549_v52 = vpop.f32.mrf.mxu3 }
 0x269   : > { %v567_v53 = vmul.f32 %v740_v51, %v549_v52 }
 0x26b   : > { %575 = vst.msk [vmem:[%s864_s21 + $0x38] sm:$0xff] %vm267_vm1, %v567_v53 }
 0x26c PF: > { %s15_s18 = sadd.s32 1, %s747_s18  }
 0x26d   : > { %p12_p4 = scmp.ge.s32.totalorder %s15_s18, 4  }
 0x26f   :  { %14 = sbr.rel (!%p12_p4) target bundleno = 1 (0x1), region = 76 }

// kernel: attention_forward.5
= control target key start
LH: loop header
LB: loop body
LE: loop exit
PB: predicated region body
PF: predicated region fallthrough
CT: control target
= control target key end

     0   :  { %s727_s26 = smov 0   ;;  %s802_s0 = inlined_call_operand.vmem [shape: f32[2,4,8,64], index: 0, kind: input, shape index: {}]   ;;  %s803_s1 = inlined_call_operand.vmem [shape: f32[4,4,8], index: 1, kind: input, shape index: {}]   ;;  %s804_s2 = inlined_call_operand.vmem [shape: f32[4,1], index: 2, kind: input, shape index: {}]   ;;  %s805_s3 = inlined_call_operand.vmem [shape: f32[4,1], index: 3, kind: input, shape index: {}]   ;;  %s806_s4 = inlined_call_operand.vmem [shape: f32[4,1], index: 4, kind: input, shape index: {}]   ;;  %s807_s5 = inlined_call_operand.<no memory space> [shape: f32[1,1], index: 5, kind: input, shape index: {}]   ;;  %s808_s6 = inlined_call_operand.vmem [shape: f32[2,4,4,64], index: 6, kind: input, shape index: {}]   ;;  %s809_s7 = inlined_call_operand.vmem [shape: f32[2,4,4,64], index: 7, kind: output, shape index: {}]  }
   0x1   :  { %v12_v0 = vstv %s807_s5 }
   0x2   :  { %13 = vst [vmem:[#allocation2] sm:$0x1] %v12_v0 }
   0x3 LB: > { %s628_s27 = sadd.s32 4294967295, %s681_s26   ;;  %p632_p0 = scmp.ge.s32.totalorder %s681_s26, 1  ;;  %s681_s26 = sphi %s727_s26, %s19_s26  }
   0x4   : > { %p249_p1 = scmp.lt.s32.totalorder %s681_s26, 3 }
   0x6   : > { %p250_p2 = pnand %p632_p0, %p249_p1 }
   0x7   : > { %p286_p3 = scmp.lt.s32.totalorder (!%p250_p2), %s628_s27, 1 }
   0x8   : > { %253 = sbr.rel (%p250_p2) target bundleno = 450 (0x1c2), region = 48 }
   0xd   : > { %s811_s27 = smov (!%p286_p3, %s628_s27), 1  ;;  %v683_v1 = vmov 0   ;;  %v303_v2 = vld [vmem:[%s804_s2] sm:$0xf]  ;;  %vm309_vm0 = vcmask 64512   ;;  %vm414_vm1 = vcmask 519168  }
   0xe   : > { %669 = vset.pattern.permute.xlu0 %v683_v1  ;;  %670 = vset.pattern.permute.xlu2 %v683_v1  ;;  %v470_v3 = vld [vmem:[%s805_s3] sm:$0xf]  ;;  %s657_s10 = sshll.u32 %s811_s27, 5  ;;  %v640_v7 = vld [vmem:[%s803_s1 + $0x4] sm:$0xf]  ;;  %s658_s12 = sshll.u32 %s811_s27, 4 }
   0xf   : > { %306 = vperm.xlu0 %669, %v303_v2   ;;  %473 = vperm.xlu2 %670, %v470_v3   ;;  %v496_v4 = vld [vmem:[%s805_s3] sm:$0xf]  ;;  %s290_s13 = scalar_lea.vmem %s802_s0, %s657_s10  ;;  %v643_v8 = vld [vmem:[%s803_s1 + $0x8] sm:$0xf]  ;;  %v646_v12 = vld [vmem:[%s803_s1 + $0xc] sm:$0xf]  ;;  %s295_s15 = scalar_lea.vmem %s808_s6, %s658_s12 }
  0x10   : > { %671 = vset.pattern.permute.xlu1 %v683_v1  ;;  %v301_v5 = vld [vmem:[%s803_s1] sm:$0xf]  ;;  %v641_v9 = vld [vmem:[%s290_s13 + $0x8] sm:$0xff]  ;;  %v644_v10 = vld [vmem:[%s290_s13 + $0x10] sm:$0xff]  ;;  %s300_s17 = scalar_lea.vmem %s809_s7, %s658_s12 }
  0x11   : > { %499 = vperm.xlu1 %671, %v496_v4   ;;  %v302_v6 = vld [vmem:[%s290_s13] sm:$0xff]  ;;  %v647_v11 = vld [vmem:[%s290_s13 + $0x18] sm:$0xff]  ;;  %355 = vmatpush.msra.mxu1 %v641_v9 }
  0x12   : > { %328 = vmatpush.msra.mxu0 %v302_v6  ;;  %382 = vmatpush.msra.mxu2 %v644_v10  ;;  %v518_v13 = vld [vmem:[%s805_s3] sm:$0xf] }
  0x13   : > { %409 = vmatpush.msra.mxu3 %v647_v11  ;;  %639 = vmatmul.msk.f32.vlgmr.msra.gmra.mxu0 %vm309_vm0, %v301_v5  ;;  %v540_v27 = vld [vmem:[%s805_s3] sm:$0xf] }
  0x14   : > { %642 = vmatmul.msk.f32.vlgmr.msra.gmra.mxu1 %vm309_vm0, %v640_v7  ;;  %645 = vmatmul.msk.f32.vlgmr.msra.gmra.mxu2 %vm309_vm0, %v643_v8  ;;  %v672_v28 = vld [vmem:[#allocation2] ss:$0 sm:$0xff] }
  0x15   : > { %648 = vmatmul.msk.f32.vlgmr.msra.gmra.mxu3 %vm309_vm0, %v646_v12  ;;  %v477_v29 = vld [vmem:[%s806_s4] sm:$0xf] }
  0x16   : > { %v503_v30 = vld [vmem:[%s806_s4] sm:$0xf] }
  0x17   : > { %521 = vperm.xlu2 %670, %v518_v13   ;;  %v525_v54 = vld [vmem:[%s806_s4] sm:$0xf] }
  0x18   : > { %v547_v55 = vld [vmem:[%s806_s4] sm:$0xf] }
  0x69   : > { %v474_v31 = vpop.permute.xlu2 %473 }
  0x71   : > { %v522_v34 = vpop.permute.xlu2 %521 }
  0x81   : > { %v307_v14 = vpop.permute.xlu0 %306 }
  0x83   : > { %v500_v32 = vpop.permute.xlu1 %499 }
  0x90   : > { %v330_v15 = vpop.f32.mrf.mxu0 }
  0x91   : > { %v331_v16 = vadd.f32 %v330_v15, %v307_v14  ;;  %v357_v17 = vpop.f32.mrf.mxu1 }
  0x92   : > { %v358_v18 = vadd.f32 %v357_v17, %v307_v14 }
  0x93   : > { %v415_v19 = vsel %vm414_vm1, %v331_v16, 0.0 }
  0x94   : > { %v419_v20 = vsel %vm414_vm1, %v358_v18, 0.0  ;;  %416 = vadd.xlane.f32.xlu0 %v415_v19 }
  0x95   : > { %420 = vadd.xlane.f32.xlu1 %v419_v20 }
  0x97   : > { %v384_v21 = vpop.f32.mrf.mxu2 }
  0x98   : > { %v385_v22 = vadd.f32 %v384_v21, %v307_v14  ;;  %v411_v23 = vpop.f32.mrf.mxu3 }
  0x99   : > { %v412_v24 = vadd.f32 %v411_v23, %v307_v14 }
  0x9a   : > { %v423_v26 = vsel %vm414_vm1, %v385_v22, 0.0 }
  0x9b   : > { %v427_v25 = vsel %vm414_vm1, %v412_v24, 0.0 }
  0x9c   : > { %428 = vadd.xlane.f32.xlu2 %v427_v25 }
  0x9d   : > { %424 = vadd.xlane.f32.xlu1 %v423_v26 }
  0xa8   : > { %543 = vperm.xlu0 %669, %v540_v27  }
  0xb0   : > { %488 = vperm.xlu0 %669, %v672_v28  }
  0xb4   : > { %480 = vperm.xlu2 %670, %v477_v29   ;;  %v492_v29 = vld [vmem:[%s295_s15] sm:$0xf] }
  0xb6   : > { %506 = vperm.xlu1 %671, %v503_v30   ;;  %v649_v30 = vld [vmem:[%s295_s15 + $0x4] sm:$0xf] }
 0x107   : > { %v417_v35 = vpop.xlane.xlu0 %416 }
 0x108   : > { %v421_v33 = vpop.xlane.xlu1 %420 }
 0x109   : > { %v422_v36 = vadd.f32 %v421_v33, %v417_v35 }
 0x10f   : > { %v429_v39 = vpop.xlane.xlu2 %428 }
 0x110   : > { %v425_v37 = vpop.xlane.xlu1 %424 }
 0x111   : > { %v426_v38 = vadd.f32 %v425_v37, %v422_v36  ;;  %v653_v36 = vld [vmem:[%s295_s15 + $0xc] sm:$0xf] }
 0x113   : > { %v430_v40 = vadd.f32 %v429_v39, %v426_v38 }
 0x115   : > { %v431_v41 = vmul.f32 0.00390625, %v430_v40 }
 0x117   : > { %v438_v42 = vsub.f32 %v358_v18, %v431_v41  ;;  %v432_v43 = vsub.f32 %v331_v16, %v431_v41  ;;  %v450_v48 = vsub.f32 %v412_v24, %v431_v41  ;;  %v444_v49 = vsub.f32 %v385_v22, %v431_v41  ;;  %v481_v56 = vpop.permute.xlu2 %480 }
 0x119   : > { %v439_v44 = vmul.f32 %v438_v42, %v438_v42  ;;  %v433_v45 = vmul.f32 %v432_v43, %v432_v43  ;;  %v451_v50 = vmul.f32 %v450_v48, %v450_v48  ;;  %v445_v51 = vmul.f32 %v444_v49, %v444_v49 }
 0x11a   : > { %v544_v8 = vpop.permute.xlu0 %543 }
 0x11b   : > { %v440_v46 = vsel %vm414_vm1, %v439_v44, 0.0  ;;  %v434_v47 = vsel %vm414_vm1, %v433_v45, 0.0  ;;  %v452_v52 = vsel %vm414_vm1, %v451_v50, 0.0  ;;  %v446_v53 = vsel %vm414_vm1, %v445_v51, 0.0 }
 0x11c   : > { %441 = vadd.xlane.f32.xlu1 %v440_v46  ;;  %435 = vadd.xlane.f32.xlu2 %v434_v47 }
 0x124   : > { %453 = vadd.xlane.f32.xlu1 %v452_v52  ;;  %447 = vadd.xlane.f32.xlu2 %v446_v53 }
 0x128   : > { %v507_v57 = vpop.permute.xlu1 %506 }
 0x13c   : > { %528 = vperm.xlu2 %670, %v525_v54  }
 0x13d   : > { %550 = vperm.xlu1 %671, %v547_v55  }
 0x18f   : > { %v442_v58 = vpop.xlane.xlu1 %441  ;;  %v436_v59 = vpop.xlane.xlu2 %435 }
 0x190   : > { %v443_v60 = vadd.f32 %v442_v58, %v436_v59 }
 0x197   : > { %v448_v61 = vpop.xlane.xlu2 %447  ;;  %v454_v63 = vpop.xlane.xlu1 %453 }
 0x198   : > { %v449_v62 = vadd.f32 %v448_v61, %v443_v60 }
 0x19a   : > { %v455_v0 = vadd.f32 %v454_v63, %v449_v62 }
 0x19c   : > { %v456_v1 = vmul.f32 0.00390625, %v455_v0 }
 0x19e   : > { %v457_v2 = vadd.f32 1e-05, %v456_v1 }
 0x19f   : > { %v529_v19 = vpop.permute.xlu2 %528 }
 0x1a0   : > { %673 = vrsqrt.f32 %v457_v2  ;;  %vm464_vm3 = vweird.f32 %v457_v2 }
 0x1a6   : > { %v674_v3 = vpop.eup %673 }
 0x1a7   : > { %v459_v4 = vmul.f32 %v674_v3, %v457_v2  ;;  %vm465_vm2 = vweird.f32 %v674_v3 }
 0x1a8   : > { %vm466_vm4 = vmor %vm464_vm3, %vm465_vm2 }
 0x1a9   : > { %v460_v5 = vmul.f32 %v674_v3, %v459_v4 }
 0x1ab   : > { %v461_v6 = vmul.f32 0.5, %v460_v5 }
 0x1ad   : > { %v462_v7 = vsub.f32 1.5, %v461_v6 }
 0x1af   : > { %v463_v9 = vmul.f32 %v674_v3, %v462_v7  ;;  %v551_v20 = vpop.permute.xlu1 %550 }
 0x1b1   : > { %v467_v10 = vsel %vm466_vm4, %v674_v3, %v463_v9 }
 0x1b2   : > { %v469_v11 = vmul.f32 %v467_v10, %v432_v43  ;;  %v495_v12 = vmul.f32 %v467_v10, %v438_v42  ;;  %v517_v13 = vmul.f32 %v467_v10, %v444_v49  ;;  %v539_v14 = vmul.f32 %v467_v10, %v450_v48 }
 0x1b4   : > { %v476_v15 = vmul.f32 %v474_v31, %v469_v11  ;;  %v502_v16 = vmul.f32 %v500_v32, %v495_v12  ;;  %v524_v17 = vmul.f32 %v522_v34, %v517_v13  ;;  %v546_v18 = vmul.f32 %v544_v8, %v539_v14  ;;  %v489_v31 = vpop.permute.xlu0 %488  ;;  %v651_v32 = vld [vmem:[%s295_s15 + $0x8] sm:$0xf] }
 0x1b6   : > { %v483_v21 = vadd.f32 %v481_v56, %v476_v15  ;;  %v509_v22 = vadd.f32 %v507_v57, %v502_v16  ;;  %v531_v23 = vadd.f32 %v529_v19, %v524_v17  ;;  %v553_v24 = vadd.f32 %v551_v20, %v546_v18 }
 0x1b8   : > { %v484_v25 = vmax.f32 %v483_v21, 0.0  ;;  %v510_v26 = vmax.f32 %v509_v22, 0.0  ;;  %v532_v27 = vmax.f32 %v531_v23, 0.0  ;;  %v554_v28 = vmax.f32 %v553_v24, 0.0 }
 0x1ba   : > { %v491_v33 = vmul.f32 %v489_v31, %v484_v25  ;;  %v511_v34 = vmul.f32 %v510_v26, %v489_v31  ;;  %v533_v35 = vmul.f32 %v532_v27, %v489_v31  ;;  %v555_v37 = vmul.f32 %v554_v28, %v489_v31 }
 0x1bc   : > { %v493_v38 = vadd.f32 %v492_v29, %v491_v33  ;;  %v514_v39 = vadd.f32 %v649_v30, %v511_v34  ;;  %v536_v40 = vadd.f32 %v651_v32, %v533_v35  ;;  %v558_v41 = vadd.f32 %v653_v36, %v555_v37 }
 0x1be   : > { %494 = vst.msk [vmem:[%s300_s17] sm:$0xf] %vm414_vm1, %v493_v38 }
 0x1bf   : > { %650 = vst.msk [vmem:[%s300_s17 + $0x4] sm:$0xf] %vm414_vm1, %v514_v39 }
 0x1c0   : > { %652 = vst.msk [vmem:[%s300_s17 + $0x8] sm:$0xf] %vm414_vm1, %v536_v40 }
 0x1c1   : > { %654 = vst.msk [vmem:[%s300_s17 + $0xc] sm:$0xf] %vm414_vm1, %v558_v41 }
 0x1c2 PF: > { %s19_s26 = sadd.s32 1, %s681_s26  }
 0x1c3   : > { %p16_p4 = scmp.ge.s32.totalorder %s19_s26, 4  }
 0x1c5   :  { %18 = sbr.rel (!%p16_p4) target bundleno = 3 (0x3), region = 93 }

</bundles_post_ra>
